<compile_context>
chip_gen: v7x
topology: tpu7x:2x2x1
jax: 0.10.0
libtpu: 0.0.40
codegen_flags: <defaults>
</compile_context>

<pallas_src>
import functools

import jax
import jax.numpy as jnp
from jax.experimental import pallas as pl
from jax.experimental.pallas import tpu as pltpu

NUM_CLASSES = 10
PADDED_CLASSES = 128          # lane-dense output width
NEG_INF_BIAS = -1e9           # padded-class bias: exp() underflows to exactly 0


def _make_mnist_kernel(n_layers: int):
    """Pallas kernel for one (TILE_B, 784) batch tile of the MLP."""

    def kernel(*refs):
        # refs = x, (mat_i, bias_i)*n_layers, final_mat, final_bias, logp_out
        x_ref = refs[0]
        w_refs = refs[1:1 + 2 * (n_layers + 1)]
        logp_ref = refs[-1]

        h = x_ref[...]                                         # (TILE_B, 784) f32
        for i in range(n_layers):
            w = w_refs[2 * i][...]                             # (in, layer)  f32
            b = w_refs[2 * i + 1][...]                         # (1, layer)   f32
            a = jnp.dot(h, w, preferred_element_type=jnp.float32) + b
            h = jax.nn.sigmoid(a)                              # f32

        wf = w_refs[2 * n_layers][...]                         # (layer, 128) f32
        bf = w_refs[2 * n_layers + 1][...]                     # (1, 128) f32 (-1e9 pad)
        logits = jnp.dot(h, wf, preferred_element_type=jnp.float32) + bf

        # Stable log_softmax along the (padded) class axis; padded columns have
        # logits ~= -1e9 so exp() underflows to 0 and they do not affect lse.
        m = jnp.max(logits, axis=1, keepdims=True)
        shifted = logits - m
        lse = jnp.log(jnp.sum(jnp.exp(shifted), axis=1, keepdims=True))
        # bf16 writeback halves the (TILE_B, 128) slab's HBM traffic.
        logp_ref[...] = (shifted - lse).astype(logp_ref.dtype)

    return kernel


def init_params(key, layer_size=20, n_layers=1, inp_size=28 * 28):
    """Deterministic xavier_normal_ weights, zero biases (matches __init__)."""
    params = []
    for _ in range(n_layers):
        key, sub = jax.random.split(key)
        std = (2.0 / (inp_size + layer_size)) ** 0.5
        params.append(jax.random.normal(sub, (inp_size, layer_size),
                                        jnp.float32) * std)
        params.append(jnp.zeros((1, layer_size), jnp.float32))
        inp_size = layer_size
    key, sub = jax.random.split(key)
    std = (2.0 / (inp_size + NUM_CLASSES)) ** 0.5
    params.append(jax.random.normal(sub, (inp_size, NUM_CLASSES),
                                    jnp.float32) * std)
    params.append(jnp.zeros((1, NUM_CLASSES), jnp.float32))
    return params


def prepare_params(params_flat):
    """One-time prep (outside jit): f32, final layer zero/-1e9 padded to 128."""
    params = [jnp.asarray(p, jnp.float32) for p in params_flat]
    fm, fb = params[-2], params[-1]
    # Padded final_mat columns MUST stay exactly zero and padded biases -1e9 so
    # the padded classes contribute exp(-1e9) == 0 to the softmax denominator.
    params[-2] = jnp.pad(fm, ((0, 0), (0, PADDED_CLASSES - fm.shape[1])))
    params[-1] = jnp.pad(fb, ((0, 0), (0, PADDED_CLASSES - fb.shape[1])),
                         constant_values=NEG_INF_BIAS)
    return tuple(params)


def _call_logp_kernel(x, params_padded, n_layers, tile_b):
    """pallas_call over a batch grid; returns (B, 128) bf16 log-probs."""
    B, D = x.shape
    grid = (pl.cdiv(B, tile_b),)          # ragged last tile OK: extra rows are
                                          # never written back, wrapper slices [:B]

    in_specs = [pl.BlockSpec((tile_b, D), lambda i: (i, 0))]        # streamed f32 x
    for p in params_padded:                                         # resident weights
        r, c = p.shape
        in_specs.append(pl.BlockSpec((r, c), lambda i: (0, 0)))
    out_specs = pl.BlockSpec((tile_b, PADDED_CLASSES), lambda i: (i, 0))

    return pl.pallas_call(
        _make_mnist_kernel(n_layers),
        out_shape=jax.ShapeDtypeStruct((B, PADDED_CLASSES), jnp.bfloat16),
        grid=grid,
        in_specs=in_specs,
        out_specs=out_specs,
        compiler_params=pltpu.CompilerParams(
            dimension_semantics=("parallel",),   # v7x: shard batch tiles over 2 TCs
            vmem_limit_bytes=32 * 1024 * 1024,   # enough for TILE_B<=2048 f32 x
        ),
    )(x, *params_padded)


@functools.partial(jax.jit, static_argnums=(3, 4))
def mnist_forward(images, labels, params_prepared, n_layers, tile_b):
    """Full MNISTNet.forward: (loss, acc, f1) plus logp / pred for inspection."""
    B = images.shape[0]
    x = images.reshape(B, 28 * 28)         # metadata-only reshape, no cast, no pad

    logp_pad = _call_logp_kernel(x, params_prepared, n_layers, tile_b)
    logp = logp_pad[:B, :NUM_CLASSES].astype(jnp.float32)   # (B, 10)

    # Cheap 10-wide reductions in XLA (kept out of the kernel per perf review).
    pred = jnp.argmax(logp, axis=1).astype(jnp.int32)        # first-max tie-break
    acc = jnp.mean((pred == labels).astype(jnp.float32))
    nll = -jnp.take_along_axis(logp, labels[:, None], axis=1)[:, 0]
    loss = jnp.mean(nll)

    # Macro F1 over classes present in labels-or-pred (sklearn's default set).
    # TODO(synk): sklearn emits per-class zero-division warnings; values match.
    f1s, present = [], []
    for c in range(NUM_CLASSES):
        tp = jnp.sum((pred == c) & (labels == c)).astype(jnp.float32)
        fp = jnp.sum((pred == c) & (labels != c)).astype(jnp.float32)
        fn = jnp.sum((pred != c) & (labels == c)).astype(jnp.float32)
        denom = 2.0 * tp + fp + fn
        f1s.append(jnp.where(denom > 0, 2.0 * tp / jnp.maximum(denom, 1.0), 0.0))
        present.append(jnp.any(labels == c) | jnp.any(pred == c))
    f1s = jnp.stack(f1s)
    present = jnp.stack(present).astype(jnp.float32)
    f1 = jnp.sum(f1s * present) / jnp.maximum(jnp.sum(present), 1.0)

    return loss, acc, f1, logp, pred


if __name__ == "__main__":
    key = jax.random.PRNGKey(0)
    k_x, k_y, k_p = jax.random.split(key, 3)

    B, LAYER_SIZE, N_LAYERS = 512, 20, 1
    TILE_B = 256   # demo: 2-tile grid (keeps both v7x TCs busy);
                   # production: sweep 1024-2048 (2048 fits the 32 MiB VMEM limit)

    # Synthetic MNIST-like batch: images (B, 1, 28, 28), integer labels in [0, 10).
    images = jax.random.normal(k_x, (B, 1, 28, 28), jnp.float32)
    labels = jax.random.randint(k_y, (B,), 0, NUM_CLASSES, jnp.int32)
    params_prepared = prepare_params(init_params(k_p, LAYER_SIZE, N_LAYERS))

    loss, acc, f1, logp, pred = mnist_forward(images, labels, params_prepared,
                                              N_LAYERS, TILE_B)
    jax.block_until_ready((loss, acc, f1, logp, pred))

    assert logp.shape == (B, NUM_CLASSES)
    assert pred.shape == (B,)
    # log_softmax rows must sum to ~1 in probability space (bf16 writeback ->
    # ~1e-2 tolerance; f32 would be ~1e-6).
    assert jnp.allclose(jnp.sum(jnp.exp(logp), axis=1), 1.0, atol=3e-2)
    assert jnp.isfinite(loss) and jnp.isfinite(acc) and jnp.isfinite(f1)

    print("KERNEL_OK")
</pallas_src>

<mosaic_0001>
module attributes {stable_mosaic.version = 11 : i64} {
  func.func @kernel(%arg0: i32, %arg1: memref<256x784xf32, #tpu.memory_space<vmem>>, %arg2: memref<784x20xf32, #tpu.memory_space<vmem>>, %arg3: memref<1x20xf32, #tpu.memory_space<vmem>>, %arg4: memref<20x128xf32, #tpu.memory_space<vmem>>, %arg5: memref<1x128xf32, #tpu.memory_space<vmem>>, %arg6: memref<256x128xbf16, #tpu.memory_space<vmem>>) attributes {dimension_semantics = [#tpu.dimension_semantics<parallel>], iteration_bounds = array<i64: 2>, scalar_prefetch = 0 : i64, scratch_operands = 0 : i64, tpu.core_type = #tpu.core_type<tc>, window_params = [{transform_indices = @transform_0, window_bounds = array<i64: 256, 784>}, {pipeline_mode = #tpu.pipeline_mode<synchronous>, transform_indices = @transform_1, window_bounds = array<i64: 784, 20>}, {pipeline_mode = #tpu.pipeline_mode<synchronous>, transform_indices = @transform_2, window_bounds = array<i64: 1, 20>}, {pipeline_mode = #tpu.pipeline_mode<synchronous>, transform_indices = @transform_3, window_bounds = array<i64: 20, 128>}, {pipeline_mode = #tpu.pipeline_mode<synchronous>, transform_indices = @transform_4, window_bounds = array<i64: 1, 128>}, {transform_indices = @transform_5, window_bounds = array<i64: 256, 128>}]} {
    %c0 = arith.constant 0 : index
    %c0_0 = arith.constant 0 : index
    %0 = vector.load %arg1[%c0, %c0_0] : memref<256x784xf32, #tpu.memory_space<vmem>>, vector<256x784xf32>
    %c0_1 = arith.constant 0 : index
    %c0_2 = arith.constant 0 : index
    %1 = vector.load %arg2[%c0_1, %c0_2] : memref<784x20xf32, #tpu.memory_space<vmem>>, vector<784x20xf32>
    %c0_3 = arith.constant 0 : index
    %c0_4 = arith.constant 0 : index
    %2 = vector.load %arg3[%c0_3, %c0_4] : memref<1x20xf32, #tpu.memory_space<vmem>>, vector<1x20xf32>
    %cst = arith.constant dense<0.000000e+00> : vector<256x20xf32>
    %3 = tpu.matmul %0, %1, %cst {dimension_numbers = #tpu.dot_dimension_numbers<[1], [0], [0], [1], [0, 0, 1, 1], [], []>} : vector<256x784xf32>, vector<784x20xf32>, vector<256x20xf32> -> vector<256x20xf32>
    %4 = vector.broadcast %2 : vector<1x20xf32> to vector<256x20xf32>
    %5 = arith.addf %3, %4 : vector<256x20xf32>
    %6 = arith.negf %5 : vector<256x20xf32>
    %7 = math.exp %6 : vector<256x20xf32>
    %cst_5 = arith.constant 1.000000e+00 : f32
    %8 = vector.broadcast %cst_5 : f32 to vector<256x20xf32>
    %9 = arith.addf %8, %7 : vector<256x20xf32>
    %10 = arith.divf %8, %9 : vector<256x20xf32>
    %c0_6 = arith.constant 0 : index
    %c0_7 = arith.constant 0 : index
    %11 = vector.load %arg4[%c0_6, %c0_7] : memref<20x128xf32, #tpu.memory_space<vmem>>, vector<20x128xf32>
    %c0_8 = arith.constant 0 : index
    %c0_9 = arith.constant 0 : index
    %12 = vector.load %arg5[%c0_8, %c0_9] : memref<1x128xf32, #tpu.memory_space<vmem>>, vector<1x128xf32>
    %cst_10 = arith.constant dense<0.000000e+00> : vector<256x128xf32>
    %13 = tpu.matmul %10, %11, %cst_10 {dimension_numbers = #tpu.dot_dimension_numbers<[1], [0], [0], [1], [0, 0, 1, 1], [], []>} : vector<256x20xf32>, vector<20x128xf32>, vector<256x128xf32> -> vector<256x128xf32>
    %14 = vector.broadcast %12 : vector<1x128xf32> to vector<256x128xf32>
    %15 = arith.addf %13, %14 : vector<256x128xf32>
    %cst_11 = arith.constant dense<0xFF800000> : vector<256xf32>
    %16 = vector.multi_reduction <maximumf>, %15, %cst_11 [1] : vector<256x128xf32> to vector<256xf32>
    %17 = vector.shape_cast %16 : vector<256xf32> to vector<256x1xf32>
    %18 = vector.broadcast %17 : vector<256x1xf32> to vector<256x128xf32>
    %19 = arith.subf %15, %18 : vector<256x128xf32>
    %20 = math.exp %19 : vector<256x128xf32>
    %cst_12 = arith.constant dense<0.000000e+00> : vector<256xf32>
    %21 = vector.multi_reduction <add>, %20, %cst_12 [1] : vector<256x128xf32> to vector<256xf32>
    %22 = vector.shape_cast %21 : vector<256xf32> to vector<256x1xf32>
    %23 = math.log %22 : vector<256x1xf32>
    %24 = vector.broadcast %23 : vector<256x1xf32> to vector<256x128xf32>
    %25 = arith.subf %19, %24 : vector<256x128xf32>
    %26 = arith.truncf %25 : vector<256x128xf32> to vector<256x128xbf16>
    %c0_13 = arith.constant 0 : index
    %c0_14 = arith.constant 0 : index
    %27 = vector.load %arg6[%c0_13, %c0_14] : memref<256x128xbf16, #tpu.memory_space<vmem>>, vector<256x128xbf16>
    tpu.vector_store %arg6[%c0_13, %c0_14], %26 {strides = array<i32>} : memref<256x128xbf16, #tpu.memory_space<vmem>>, vector<256x128xbf16>,
    return
  }
  func.func @transform_0(%arg0: i32) -> (i32, i32) {
    %c0_i32 = arith.constant 0 : i32
    %c0_i32_0 = arith.constant 0 : i32
    return %arg0, %c0_i32 : i32, i32
  }
  func.func @transform_1(%arg0: i32) -> (i32, i32) {
    %c0_i32 = arith.constant 0 : i32
    %c0_i32_0 = arith.constant 0 : i32
    %c0_i32_1 = arith.constant 0 : i32
    return %c0_i32, %c0_i32_0 : i32, i32
  }
  func.func @transform_2(%arg0: i32) -> (i32, i32) {
    %c0_i32 = arith.constant 0 : i32
    %c0_i32_0 = arith.constant 0 : i32
    %c0_i32_1 = arith.constant 0 : i32
    return %c0_i32, %c0_i32_0 : i32, i32
  }
  func.func @transform_3(%arg0: i32) -> (i32, i32) {
    %c0_i32 = arith.constant 0 : i32
    %c0_i32_0 = arith.constant 0 : i32
    %c0_i32_1 = arith.constant 0 : i32
    return %c0_i32, %c0_i32_0 : i32, i32
  }
  func.func @transform_4(%arg0: i32) -> (i32, i32) {
    %c0_i32 = arith.constant 0 : i32
    %c0_i32_0 = arith.constant 0 : i32
    %c0_i32_1 = arith.constant 0 : i32
    return %c0_i32, %c0_i32_0 : i32, i32
  }
  func.func @transform_5(%arg0: i32) -> (i32, i32) {
    %c0_i32 = arith.constant 0 : i32
    %c0_i32_0 = arith.constant 0 : i32
    return %arg0, %c0_i32 : i32, i32
  }
}

</mosaic_0001>

<bundles_post_ra>
// kernel: mnist_forward.1
= control target key start
LH: loop header
LB: loop body
LE: loop exit
PB: predicated region body
PF: predicated region fallthrough
CT: control target
= control target key end

     0   :  { %s3650_s18 = smov 0   ;;  %s4825_s0 = inlined_call_operand.vmem [shape: f32[512,784], index: 0, kind: input, shape index: {}]   ;;  %s4826_s1 = inlined_call_operand.vmem [shape: f32[784,20], index: 1, kind: input, shape index: {}]   ;;  %s4827_s2 = inlined_call_operand.vmem [shape: f32[1,20], index: 2, kind: input, shape index: {}]   ;;  %s4828_s3 = inlined_call_operand.vmem [shape: f32[20,128], index: 3, kind: input, shape index: {}]   ;;  %s4829_s4 = inlined_call_operand.vmem [shape: f32[1,128], index: 4, kind: input, shape index: {}]   ;;  %s4830_s5 = inlined_call_operand.vmem [shape: bf16[512,128], index: 5, kind: output, shape index: {}]  }
   0x1 LB: > { %s2621_s19 = sadd.s32 4294967295, %s3617_s18   ;;  %p2625_p0 = scmp.ge.s32.totalorder %s3617_s18, 1  ;;  %s3617_s18 = sphi %s3650_s18, %s15_s18  }
   0x2   : > { %p189_p1 = scmp.lt.s32.totalorder %s3617_s18, 3 }
   0x4   : > { %p190_p2 = pnand %p2625_p0, %p189_p1 }
   0x5   : > { %v487_v0 = vld [vmem:[%s4826_s1 + $0x100] sm:$0xff] (!%p190_p2)  ;;  %v488_v1 = vld [vmem:[%s4826_s1 + $0x108] sm:$0xff] (!%p190_p2)  ;;  %v3619_v3 = vmov (!%p190_p2), 0.0|0.0   ;;  %v489_v6 = vld [vmem:[%s4826_s1 + $0x110] sm:$0xff] (!%p190_p2)  ;;  %s2626_s11 = sshll.u32 (!%p190_p2), %s2621_s19, 5  ;;  %vm560_vm0 = vcmask (!%p190_p2), 130048  }
   0x6   : > { %193 = sbr.rel (%p190_p2) target bundleno = 1097 (0x449), region = 40  ;;  %v455_v2 = vld [vmem:[%s4826_s1] sm:$0xff] (!%p190_p2)  ;;  %3113 = vmatprep.subr.bf16.mxu0 (!%p190_p2), %v3619_v3  ;;  %3065 = vmatprep.subr.bf16.mxu1 (!%p190_p2), %v3619_v3  ;;  %v3114_v4 = vpack.c.bf16 (!%p190_p2), %v488_v1, %v487_v0  ;;  %v456_v5 = vld [vmem:[%s4826_s1 + $0x8] sm:$0xff] (!%p190_p2)  ;;  %v490_v7 = vld [vmem:[%s4826_s1 + $0x118] sm:$0xff] (!%p190_p2)  ;;  %p219_p3 = scmp.lt.s32.totalorder (!%p190_p2), %s2626_s11, 63  ;;  %vm1856_vm1 = vcmask (!%p190_p2), 1043456  }
   0x7   : > { %v3066_v8 = vpack.c.bf16 (!%p190_p2), %v456_v5, %v455_v2  ;;  %v457_v9 = vld [vmem:[%s4826_s1 + $0x10] sm:$0xff] (!%p190_p2)  ;;  %v458_v10 = vld [vmem:[%s4826_s1 + $0x18] sm:$0xff] (!%p190_p2)  ;;  %v3117_v11 = vpack.c.bf16 (!%p190_p2), %v490_v7, %v489_v6  ;;  %v491_v13 = vld [vmem:[%s4826_s1 + $0x120] sm:$0xff] (!%p190_p2)  ;;  %vm1759_vm2 = vcmask (!%p190_p2), 162816  }
   0x8   : > { %3115 = vmatpush1.bf16.msra.mxu0 (!%p190_p2), %v3114_v4  ;;  %v3069_v12 = vpack.c.bf16 (!%p190_p2), %v458_v10, %v457_v9  ;;  %v492_v14 = vld [vmem:[%s4826_s1 + $0x128] sm:$0xff] (!%p190_p2)  ;;  %v459_v15 = vld [vmem:[%s4826_s1 + $0x20] sm:$0xff] (!%p190_p2)  ;;  %v493_v19 = vld [vmem:[%s4826_s1 + $0x130] sm:$0xff] (!%p190_p2) }
   0x9   : > { %3067 = vmatpush1.bf16.msra.mxu1 (!%p190_p2), %v3066_v8  ;;  %3116 = vmatprep.subr.bf16.mxu0 (!%p190_p2), %v3619_v3  ;;  %v460_v16 = vld [vmem:[%s4826_s1 + $0x28] sm:$0xff] (!%p190_p2)  ;;  %v3120_v17 = vpack.c.bf16 (!%p190_p2), %v492_v14, %v491_v13  ;;  %v494_v20 = vld [vmem:[%s4826_s1 + $0x138] sm:$0xff] (!%p190_p2)  ;;  %v461_v21 = vld [vmem:[%s4826_s1 + $0x30] sm:$0xff] (!%p190_p2) }
   0xa   : > { %3068 = vmatprep.subr.bf16.mxu1 (!%p190_p2), %v3619_v3  ;;  %v3072_v18 = vpack.c.bf16 (!%p190_p2), %v460_v16, %v459_v15  ;;  %v462_v22 = vld [vmem:[%s4826_s1 + $0x38] sm:$0xff] (!%p190_p2)  ;;  %v3123_v23 = vpack.c.bf16 (!%p190_p2), %v494_v20, %v493_v19  ;;  %v495_v25 = vld [vmem:[%s4826_s1 + $0x140] sm:$0xff] (!%p190_p2)  ;;  %v496_v26 = vld [vmem:[%s4826_s1 + $0x148] sm:$0xff] (!%p190_p2) }
   0xb   : > { %v3075_v24 = vpack.c.bf16 (!%p190_p2), %v462_v22, %v461_v21  ;;  %v463_v27 = vld [vmem:[%s4826_s1 + $0x40] sm:$0xff] (!%p190_p2)  ;;  %v464_v28 = vld [vmem:[%s4826_s1 + $0x48] sm:$0xff] (!%p190_p2)  ;;  %v3126_v29 = vpack.c.bf16 (!%p190_p2), %v496_v26, %v495_v25  ;;  %v497_v31 = vld [vmem:[%s4826_s1 + $0x150] sm:$0xff] (!%p190_p2) }
   0xc   : > { %3118 = vmatpush1.bf16.msra.mxu0 (!%p190_p2), %v3117_v11  ;;  %v3078_v30 = vpack.c.bf16 (!%p190_p2), %v464_v28, %v463_v27  ;;  %v498_v32 = vld [vmem:[%s4826_s1 + $0x158] sm:$0xff] (!%p190_p2)  ;;  %v465_v33 = vld [vmem:[%s4826_s1 + $0x50] sm:$0xff] (!%p190_p2)  ;;  %v499_v37 = vld [vmem:[%s4826_s1 + $0x160] sm:$0xff] (!%p190_p2) }
   0xd   : > { %3070 = vmatpush1.bf16.msra.mxu1 %v3069_v12  ;;  %3119 = vmatprep.subr.bf16.mxu0 %v3619_v3  ;;  %s4832_s11 = smov (!%p219_p3, %s2626_s11), 63  ;;  %v466_v34 = vld [vmem:[%s4826_s1 + $0x58] sm:$0xff]  ;;  %v3129_v35 = vpack.c.bf16 %v498_v32, %v497_v31  ;;  %v500_v38 = vld [vmem:[%s4826_s1 + $0x168] sm:$0xff]  ;;  %v467_v39 = vld [vmem:[%s4826_s1 + $0x60] sm:$0xff] }
   0xe   : > { %3071 = vmatprep.subr.bf16.mxu1 %v3619_v3  ;;  %s3345_s13 = smul.u32 56, %s4832_s11  ;;  %v3081_v36 = vpack.c.bf16 %v466_v34, %v465_v33  ;;  %v468_v40 = vld [vmem:[%s4826_s1 + $0x68] sm:$0xff]  ;;  %v3132_v43 = vpack.c.bf16 %v500_v38, %v499_v37  ;;  %v501_v45 = vld [vmem:[%s4826_s1 + $0x170] sm:$0xff]  ;;  %v502_v46 = vld [vmem:[%s4826_s1 + $0x178] sm:$0xff]  ;;  %s2629_s29 = sshll.u32 %s4832_s11, 2 }
   0xf   : > { %v3084_v44 = vpack.c.bf16 %v468_v40, %v467_v39  ;;  %v469_v47 = vld [vmem:[%s4826_s1 + $0x70] sm:$0xff]  ;;  %v470_v48 = vld [vmem:[%s4826_s1 + $0x78] sm:$0xff]  ;;  %v3135_v49 = vpack.c.bf16 %v502_v46, %v501_v45  ;;  %v503_v51 = vld [vmem:[%s4826_s1 + $0x180] sm:$0xff]  ;;  %s4774_s7 = scalar_lea.vmem %s4830_s5, %s2629_s29 }
  0x10   : > { %3121 = vmatpush1.bf16.msra.mxu0 %v3120_v17  ;;  %s3746_s25 = scalar_lea.vmem %s4825_s0, %s3345_s13  ;;  %v3087_v50 = vpack.c.bf16 %v470_v48, %v469_v47  ;;  %v504_v52 = vld [vmem:[%s4826_s1 + $0x188] sm:$0xff]  ;;  %v471_v53 = vld [vmem:[%s4826_s1 + $0x80] sm:$0xff]  ;;  %v505_v57 = vld [vmem:[%s4826_s1 + $0x190] sm:$0xff] }
  0x11   : > { %3073 = vmatpush1.bf16.msra.mxu1 %v3072_v18  ;;  %3122 = vmatprep.subr.bf16.mxu0 %v3619_v3  ;;  %v234_v41 = vld [vmem:[%s3746_s25 + $0x18] sm:$0xff]  ;;  %v232_v42 = vld [vmem:[%s3746_s25 + $0x8] sm:$0xff]  ;;  %v3138_v55 = vpack.c.bf16 %v504_v52, %v503_v51  ;;  %v473_v59 = vld [vmem:[%s4826_s1 + $0x90] sm:$0xff] }
  0x12   : > { %3074 = vmatprep.subr.bf16.mxu1 %v3619_v3  ;;  %946 = vmatprep.mubr.f32.mxu0 %v234_v41  ;;  %v472_v54 = vld [vmem:[%s4826_s1 + $0x88] sm:$0xff]  ;;  %v506_v58 = vld [vmem:[%s4826_s1 + $0x198] sm:$0xff]  ;;  %v507_v63 = vld [vmem:[%s4826_s1 + $0x1a0] sm:$0xff] }
  0x13   : > { %721 = vmatprep.mubr.f32.mxu1 %v232_v42  ;;  %v3090_v56 = vpack.c.bf16 %v472_v54, %v471_v53  ;;  %v474_v60 = vld [vmem:[%s4826_s1 + $0x98] sm:$0xff]  ;;  %v3141_v61 = vpack.c.bf16 %v506_v58, %v505_v57  ;;  %v508_v0 = vld [vmem:[%s4826_s1 + $0x1a8] sm:$0xff]  ;;  %v475_v1 = vld [vmem:[%s4826_s1 + $0xa0] sm:$0xff] }
  0x14   : > { %3124 = vmatpush1.bf16.msra.mxu0 %v3123_v23  ;;  %v3093_v62 = vpack.c.bf16 %v474_v60, %v473_v59  ;;  %v476_v2 = vld [vmem:[%s4826_s1 + $0xa8] sm:$0xff]  ;;  %v3144_v4 = vpack.c.bf16 %v508_v0, %v507_v63  ;;  %v509_v6 = vld [vmem:[%s4826_s1 + $0x1b0] sm:$0xff]  ;;  %v510_v7 = vld [vmem:[%s4826_s1 + $0x1b8] sm:$0xff] }
  0x15   : > { %3076 = vmatpush1.bf16.msra.mxu1 %v3075_v24  ;;  %3125 = vmatprep.subr.bf16.mxu0 %v3619_v3  ;;  %v3096_v5 = vpack.c.bf16 %v476_v2, %v475_v1  ;;  %v477_v8 = vld [vmem:[%s4826_s1 + $0xb0] sm:$0xff]  ;;  %v478_v9 = vld [vmem:[%s4826_s1 + $0xb8] sm:$0xff]  ;;  %v3147_v10 = vpack.c.bf16 %v510_v7, %v509_v6  ;;  %v511_v12 = vld [vmem:[%s4826_s1 + $0x1c0] sm:$0xff] }
  0x16   : > { %3077 = vmatprep.subr.bf16.mxu1 %v3619_v3  ;;  %v3099_v11 = vpack.c.bf16 %v478_v9, %v477_v8  ;;  %v512_v13 = vld [vmem:[%s4826_s1 + $0x1c8] sm:$0xff]  ;;  %v479_v14 = vld [vmem:[%s4826_s1 + $0xc0] sm:$0xff]  ;;  %v513_v18 = vld [vmem:[%s4826_s1 + $0x1d0] sm:$0xff] }
  0x17   : > { %v480_v15 = vld [vmem:[%s4826_s1 + $0xc8] sm:$0xff]  ;;  %v3150_v16 = vpack.c.bf16 %v512_v13, %v511_v12  ;;  %v514_v19 = vld [vmem:[%s4826_s1 + $0x1d8] sm:$0xff]  ;;  %v481_v20 = vld [vmem:[%s4826_s1 + $0xd0] sm:$0xff] }
  0x18   : > { %3127 = vmatpush1.bf16.msra.mxu0 %v3126_v29  ;;  %v3102_v17 = vpack.c.bf16 %v480_v15, %v479_v14  ;;  %v482_v21 = vld [vmem:[%s4826_s1 + $0xd8] sm:$0xff]  ;;  %v3153_v22 = vpack.c.bf16 %v514_v19, %v513_v18  ;;  %v515_v24 = vld [vmem:[%s4826_s1 + $0x1e0] sm:$0xff]  ;;  %v516_v25 = vld [vmem:[%s4826_s1 + $0x1e8] sm:$0xff] }
  0x19   : > { %3079 = vmatpush1.bf16.msra.mxu1 %v3078_v30  ;;  %3128 = vmatprep.subr.bf16.mxu0 %v3619_v3  ;;  %v3105_v23 = vpack.c.bf16 %v482_v21, %v481_v20  ;;  %v483_v26 = vld [vmem:[%s4826_s1 + $0xe0] sm:$0xff]  ;;  %v484_v27 = vld [vmem:[%s4826_s1 + $0xe8] sm:$0xff]  ;;  %v3156_v28 = vpack.c.bf16 %v516_v25, %v515_v24  ;;  %v517_v30 = vld [vmem:[%s4826_s1 + $0x1f0] sm:$0xff] }
  0x1a   : > { %3080 = vmatprep.subr.bf16.mxu1 %v3619_v3  ;;  %v3108_v29 = vpack.c.bf16 %v484_v27, %v483_v26  ;;  %v518_v31 = vld [vmem:[%s4826_s1 + $0x1f8] sm:$0xff]  ;;  %v485_v32 = vld [vmem:[%s4826_s1 + $0xf0] sm:$0xff]  ;;  %v551_v34 = vld [vmem:[%s4826_s1 + $0x300] sm:$0xff] }
  0x1b   : > { %v486_v33 = vld [vmem:[%s4826_s1 + $0xf8] sm:$0xff]  ;;  %v519_v38 = vld [vmem:[%s4826_s1 + $0x200] sm:$0xff]  ;;  %v520_v39 = vld [vmem:[%s4826_s1 + $0x208] sm:$0xff] }
  0x1c   : > { %3130 = vmatpush1.bf16.msra.mxu0 %v3129_v35  ;;  %v552_v35 = vld [vmem:[%s4826_s1 + $0x308] sm:$0xff]  ;;  %v3111_v37 = vpack.c.bf16 %v486_v33, %v485_v32  ;;  %v233_v41 = vld [vmem:[%s3746_s25 + $0x10] sm:$0xff]  ;;  %v3162_v42 = vpack.c.bf16 %v520_v39, %v519_v38  ;;  %v239_v45 = vld [vmem:[%s3746_s25 + $0x40] sm:$0xff] }
  0x1d   : > { %3082 = vmatpush1.bf16.msra.mxu1 %v3081_v36  ;;  %3131 = vmatprep.subr.bf16.mxu0 %v3619_v3  ;;  %v3159_v36 = vpack.c.bf16 %v518_v31, %v517_v30  ;;  %v3209_v40 = vpack.c.bf16 %v552_v35, %v551_v34  ;;  %v521_v46 = vld [vmem:[%s4826_s1 + $0x210] sm:$0xff]  ;;  %v522_v47 = vld [vmem:[%s4826_s1 + $0x218] sm:$0xff]  ;;  %v240_v48 = vld [vmem:[%s3746_s25 + $0x48] sm:$0xff] }
  0x1e   : > { %3083 = vmatprep.subr.bf16.mxu1 %v3619_v3  ;;  %v3165_v51 = vpack.c.bf16 %v522_v47, %v521_v46  ;;  %v246_v52 = vld [vmem:[%s3746_s25 + $0x78] sm:$0xff]  ;;  %v523_v53 = vld [vmem:[%s4826_s1 + $0x220] sm:$0xff]  ;;  %v524_v54 = vld [vmem:[%s4826_s1 + $0x228] sm:$0xff] }
  0x1f   : > { %v255_v57 = vld [vmem:[%s3746_s25 + $0xc0] sm:$0xff]  ;;  %v3168_v58 = vpack.c.bf16 %v524_v54, %v523_v53  ;;  %v253_v59 = vld [vmem:[%s3746_s25 + $0xb0] sm:$0xff]  ;;  %v252_v63 = vld [vmem:[%s3746_s25 + $0xa8] sm:$0xff] }
  0x20   : > { %3133 = vmatpush1.bf16.msra.mxu0 %v3132_v43  ;;  %v231_v43 = vld [vmem:[%s3746_s25] sm:$0xff]  ;;  %v525_v60 = vld [vmem:[%s4826_s1 + $0x230] sm:$0xff]  ;;  %v262_v0 = vld [vmem:[%s3746_s25 + $0xf8] sm:$0xff] }
  0x21   : > { %3085 = vmatpush1.bf16.msra.mxu1 %v3084_v44  ;;  %3134 = vmatprep.subr.bf16.mxu0 %v3619_v3  ;;  %v241_v44 = vld [vmem:[%s3746_s25 + $0x50] sm:$0xff]  ;;  %v260_v2 = vld [vmem:[%s3746_s25 + $0xe8] sm:$0xff]  ;;  %v259_v7 = vld [vmem:[%s3746_s25 + $0xe0] sm:$0xff] }
  0x22   : > { %3086 = vmatprep.subr.bf16.mxu1 %v3619_v3  ;;  %v261_v6 = vld [vmem:[%s3746_s25 + $0xf0] sm:$0xff]  ;;  %v530_v12 = vld [vmem:[%s4826_s1 + $0x258] sm:$0xff]  ;;  %v268_v13 = vld [vmem:[%s3746_s25 + $0x128] sm:$0xff] }
  0x23   : > { %v269_v8 = vld [vmem:[%s3746_s25 + $0x130] sm:$0xff]  ;;  %v266_v14 = vld [vmem:[%s3746_s25 + $0x118] sm:$0xff]  ;;  %v276_v15 = vld [vmem:[%s3746_s25 + $0x168] sm:$0xff] }
  0x24   : > { %3136 = vmatpush1.bf16.msra.mxu0 %v3135_v49  ;;  %v238_v49 = vld [vmem:[%s3746_s25 + $0x38] sm:$0xff]  ;;  %v531_v18 = vld [vmem:[%s4826_s1 + $0x260] sm:$0xff]  ;;  %v532_v19 = vld [vmem:[%s4826_s1 + $0x268] sm:$0xff] }
  0x25   : > { %3088 = vmatpush1.bf16.msra.mxu1 %v3087_v50  ;;  %3137 = vmatprep.subr.bf16.mxu0 %v3619_v3  ;;  %v248_v50 = vld [vmem:[%s3746_s25 + $0x88] sm:$0xff]  ;;  %v275_v20 = vld [vmem:[%s3746_s25 + $0x160] sm:$0xff]  ;;  %v273_v21 = vld [vmem:[%s3746_s25 + $0x150] sm:$0xff] }
  0x26   : > { %3089 = vmatprep.subr.bf16.mxu1 %v3619_v3  ;;  %v281_v24 = vld [vmem:[%s3746_s25 + $0x190] sm:$0xff]  ;;  %v534_v26 = vld [vmem:[%s4826_s1 + $0x278] sm:$0xff]  ;;  %v288_v31 = vld [vmem:[%s3746_s25 + $0x1c8] sm:$0xff] }
  0x27   : > { %v533_v25 = vld [vmem:[%s4826_s1 + $0x270] sm:$0xff]  ;;  %v282_v27 = vld [vmem:[%s3746_s25 + $0x198] sm:$0xff]  ;;  %v535_v32 = vld [vmem:[%s4826_s1 + $0x280] sm:$0xff] }
  0x28   : > { %3139 = vmatpush1.bf16.msra.mxu0 %v3138_v55  ;;  %v247_v55 = vld [vmem:[%s3746_s25 + $0x80] sm:$0xff]  ;;  %v3183_v30 = vpack.c.bf16 %v534_v26, %v533_v25  ;;  %v536_v33 = vld [vmem:[%s4826_s1 + $0x288] sm:$0xff]  ;;  %v289_v34 = vld [vmem:[%s3746_s25 + $0x1d0] sm:$0xff] }
  0x29   : > { %3091 = vmatpush1.bf16.msra.mxu1 %v3090_v56  ;;  %3140 = vmatprep.subr.bf16.mxu0 %v3619_v3  ;;  %v245_v56 = vld [vmem:[%s3746_s25 + $0x70] sm:$0xff]  ;;  %v287_v35 = vld [vmem:[%s3746_s25 + $0x1c0] sm:$0xff]  ;;  %v540_v47 = vld [vmem:[%s4826_s1 + $0x2a8] sm:$0xff] }
  0x2a   : > { %3092 = vmatprep.subr.bf16.mxu1 %v3619_v3  ;;  %v295_v38 = vld [vmem:[%s3746_s25 + $0x200] sm:$0xff]  ;;  %v537_v39 = vld [vmem:[%s4826_s1 + $0x290] sm:$0xff]  ;;  %v542_v54 = vld [vmem:[%s4826_s1 + $0x2b8] sm:$0xff] }
  0x2b   : > { %v539_v46 = vld [vmem:[%s4826_s1 + $0x2a0] sm:$0xff]  ;;  %v541_v53 = vld [vmem:[%s4826_s1 + $0x2b0] sm:$0xff] }
  0x2c   : > { %3142 = vmatpush1.bf16.msra.mxu0 %v3141_v61  ;;  %v526_v61 = vld [vmem:[%s4826_s1 + $0x238] sm:$0xff]  ;;  %v345_v25 = vld [vmem:[%s3746_s25 + $0x390] sm:$0xff]  ;;  %v343_v26 = vld [vmem:[%s3746_s25 + $0x380] sm:$0xff] }
  0x2d   : > { %3094 = vmatpush1.bf16.msra.mxu1 %v3093_v62  ;;  %3143 = vmatprep.subr.bf16.mxu0 %v3619_v3  ;;  %v254_v62 = vld [vmem:[%s3746_s25 + $0xb8] sm:$0xff]  ;;  %v3171_v1 = vpack.c.bf16 %v526_v61, %v525_v60  ;;  %v543_v60 = vld [vmem:[%s4826_s1 + $0x2c0] sm:$0xff]  ;;  %v544_v61 = vld [vmem:[%s4826_s1 + $0x2c8] sm:$0xff] }
  0x2e   : > { %3095 = vmatprep.subr.bf16.mxu1 %v3619_v3 }
  0x30   : > { %3145 = vmatpush1.bf16.msra.mxu0 %v3144_v4  ;;  %v527_v4 = vld [vmem:[%s4826_s1 + $0x240] sm:$0xff] }
  0x31   : > { %3097 = vmatpush1.bf16.msra.mxu1 %v3096_v5  ;;  %3146 = vmatprep.subr.bf16.mxu0 %v3619_v3  ;;  %v528_v5 = vld [vmem:[%s4826_s1 + $0x248] sm:$0xff] }
  0x32   : > { %3098 = vmatprep.subr.bf16.mxu1 %v3619_v3  ;;  %v3174_v9 = vpack.c.bf16 %v528_v5, %v527_v4  ;;  %v545_v4 = vld [vmem:[%s4826_s1 + $0x2d0] sm:$0xff]  ;;  %v546_v5 = vld [vmem:[%s4826_s1 + $0x2d8] sm:$0xff] }
  0x34   : > { %3148 = vmatpush1.bf16.msra.mxu0 %v3147_v10  ;;  %v267_v10 = vld [vmem:[%s3746_s25 + $0x120] sm:$0xff] }
  0x35   : > { %3100 = vmatpush1.bf16.msra.mxu1 %v3099_v11  ;;  %3149 = vmatprep.subr.bf16.mxu0 %v3619_v3  ;;  %v529_v11 = vld [vmem:[%s4826_s1 + $0x250] sm:$0xff] }
  0x36   : > { %3101 = vmatprep.subr.bf16.mxu1 %v3619_v3 }
  0x38   : > { %3151 = vmatpush1.bf16.msra.mxu0 %v3150_v16  ;;  %v3177_v16 = vpack.c.bf16 %v530_v12, %v529_v11  ;;  %v547_v11 = vld [vmem:[%s4826_s1 + $0x2e0] sm:$0xff]  ;;  %v548_v12 = vld [vmem:[%s4826_s1 + $0x2e8] sm:$0xff] }
  0x39   : > { %3103 = vmatpush1.bf16.msra.mxu1 %v3102_v17  ;;  %3152 = vmatprep.subr.bf16.mxu0 %v3619_v3  ;;  %v274_v17 = vld [vmem:[%s3746_s25 + $0x158] sm:$0xff] }
  0x3a   : > { %3104 = vmatprep.subr.bf16.mxu1 %v3619_v3 }
  0x3c   : > { %3154 = vmatpush1.bf16.msra.mxu0 %v3153_v22  ;;  %v283_v22 = vld [vmem:[%s3746_s25 + $0x1a0] sm:$0xff] }
  0x3d   : > { %3106 = vmatpush1.bf16.msra.mxu1 %v3105_v23  ;;  %3155 = vmatprep.subr.bf16.mxu0 %v3619_v3  ;;  %v3180_v23 = vpack.c.bf16 %v532_v19, %v531_v18  ;;  %v549_v18 = vld [vmem:[%s4826_s1 + $0x2f0] sm:$0xff]  ;;  %v550_v19 = vld [vmem:[%s4826_s1 + $0x2f8] sm:$0xff] }
  0x3e   : > { %3107 = vmatprep.subr.bf16.mxu1 %v3619_v3 }
  0x40   : > { %3157 = vmatpush1.bf16.msra.mxu0 %v3156_v28  ;;  %v280_v28 = vld [vmem:[%s3746_s25 + $0x188] sm:$0xff] }
  0x41   : > { %3109 = vmatpush1.bf16.msra.mxu1 %v3108_v29  ;;  %3158 = vmatprep.subr.bf16.mxu0 %v3619_v3  ;;  %v290_v29 = vld [vmem:[%s3746_s25 + $0x1d8] sm:$0xff] }
  0x42   : > { %3110 = vmatprep.subr.bf16.mxu1 %v3619_v3 }
  0x44   : > { %3160 = vmatpush1.bf16.msra.mxu0 %v3159_v36  ;;  %v297_v36 = vld [vmem:[%s3746_s25 + $0x210] sm:$0xff] }
  0x45   : > { %3112 = vmatpush1.bf16.msra.mxu1 %v3111_v37  ;;  %3161 = vmatprep.subr.bf16.mxu0 %v3619_v3  ;;  %v3186_v37 = vpack.c.bf16 %v536_v33, %v535_v32  ;;  %v359_v32 = vld [vmem:[%s3746_s25 + $0x400] sm:$0xff]  ;;  %v357_v33 = vld [vmem:[%s3746_s25 + $0x3f0] sm:$0xff] }
  0x46   : > { %3210 = vmatprep.subr.bf16.mxu1 %v3209_v40 }
  0x47   : > { %947 = vmatmul.mubr.f32.vlgmr.msra.gmra.mrb[0].mxu0 %v233_v41  ;;  %v296_v41 = vld [vmem:[%s3746_s25 + $0x208] sm:$0xff] }
  0x48   : > { %722 = vmatmul.mubr.f32.vlgmr.msra.gmra.mrb[0].mxu1 %v231_v43  ;;  %3163 = vmatpush1.bf16.msra.mxu0 %v3162_v42  ;;  %v294_v42 = vld [vmem:[%s3746_s25 + $0x1f8] sm:$0xff]  ;;  %v304_v43 = vld [vmem:[%s3746_s25 + $0x248] sm:$0xff] }
  0x49   : > { %951 = vmatprep.mubr.f32.mxu0 %v241_v44  ;;  %726 = vmatprep.mubr.f32.mxu1 %v239_v45  ;;  %v302_v45 = vld [vmem:[%s3746_s25 + $0x238] sm:$0xff] }
  0x4a   : > { %3164 = vmatprep.subr.bf16.mxu0 %v3619_v3  ;;  %3212 = vmatpush3.bf16.msra.mxu1 %v3209_v40  ;;  %v538_v40 = vld [vmem:[%s4826_s1 + $0x298] sm:$0xff] }
  0x4b   : > { %952 = vmatmul.mubr.f32.gmra.mrb[2].mxu0 %v240_v48  ;;  %v3189_v44 = vpack.c.bf16 %v538_v40, %v537_v39  ;;  %v303_v48 = vld [vmem:[%s3746_s25 + $0x240] sm:$0xff]  ;;  %v372_v39 = vld [vmem:[%s3746_s25 + $0x468] sm:$0xff]  ;;  %v373_v40 = vld [vmem:[%s3746_s25 + $0x470] sm:$0xff] }
  0x4c   : > { %727 = vmatmul.mubr.f32.gmra.mrb[2].mxu1 %v238_v49  ;;  %956 = vmatprep.mubr.f32.mxu0 %v248_v50  ;;  %v301_v49 = vld [vmem:[%s3746_s25 + $0x230] sm:$0xff]  ;;  %v311_v50 = vld [vmem:[%s3746_s25 + $0x280] sm:$0xff] }
  0x4d   : > { %731 = vmatprep.mubr.f32.mxu1 %v246_v52  ;;  %3166 = vmatpush1.bf16.msra.mxu0 %v3165_v51  ;;  %v3192_v51 = vpack.c.bf16 %v540_v47, %v539_v46  ;;  %v309_v52 = vld [vmem:[%s3746_s25 + $0x270] sm:$0xff]  ;;  %v388_v46 = vld [vmem:[%s3746_s25 + $0x4e8] sm:$0xff]  ;;  %v386_v47 = vld [vmem:[%s3746_s25 + $0x4d8] sm:$0xff] }
  0x4e   : > { %3167 = vmatprep.subr.bf16.mxu0 %v3619_v3 }
  0x4f   : > { %957 = vmatmul.mubr.f32.gmra.mrb[4].mxu0 %v247_v55  ;;  %v310_v55 = vld [vmem:[%s3746_s25 + $0x278] sm:$0xff] }
  0x50   : > { %732 = vmatmul.mubr.f32.gmra.mrb[4].mxu1 %v245_v56  ;;  %961 = vmatprep.mubr.f32.mxu0 %v255_v57  ;;  %v308_v56 = vld [vmem:[%s3746_s25 + $0x268] sm:$0xff]  ;;  %v318_v57 = vld [vmem:[%s3746_s25 + $0x2b8] sm:$0xff] }
  0x51   : > { %736 = vmatprep.mubr.f32.mxu1 %v253_v59  ;;  %3169 = vmatpush1.bf16.msra.mxu0 %v3168_v58  ;;  %v3195_v58 = vpack.c.bf16 %v542_v54, %v541_v53  ;;  %v316_v59 = vld [vmem:[%s3746_s25 + $0x2a8] sm:$0xff]  ;;  %v402_v54 = vld [vmem:[%s3746_s25 + $0x558] sm:$0xff] }
  0x52   : > { %3170 = vmatprep.subr.bf16.mxu0 %v3619_v3  ;;  %v392_v53 = vld [vmem:[%s3746_s25 + $0x508] sm:$0xff] }
  0x53   : > { %962 = vmatmul.mubr.f32.gmra.mrb[6].mxu0 %v254_v62  ;;  %v317_v62 = vld [vmem:[%s3746_s25 + $0x2b0] sm:$0xff] }
  0x54   : > { %737 = vmatmul.mubr.f32.gmra.mrb[6].mxu1 %v252_v63  ;;  %966 = vmatprep.mubr.f32.mxu0 %v262_v0  ;;  %v315_v63 = vld [vmem:[%s3746_s25 + $0x2a0] sm:$0xff]  ;;  %v325_v0 = vld [vmem:[%s3746_s25 + $0x2f0] sm:$0xff] }
  0x55   : > { %741 = vmatprep.mubr.f32.mxu1 %v260_v2  ;;  %3172 = vmatpush1.bf16.msra.mxu0 %v3171_v1  ;;  %v3198_v1 = vpack.c.bf16 %v544_v61, %v543_v60  ;;  %v323_v2 = vld [vmem:[%s3746_s25 + $0x2e0] sm:$0xff]  ;;  %v408_v60 = vld [vmem:[%s3746_s25 + $0x588] sm:$0xff]  ;;  %v406_v61 = vld [vmem:[%s3746_s25 + $0x578] sm:$0xff] }
  0x56   : > { %3173 = vmatprep.subr.bf16.mxu0 %v3619_v3 }
  0x57   : > { %967 = vmatmul.mubr.f32.gmra.mrb[8].mxu0 %v261_v6  ;;  %v324_v6 = vld [vmem:[%s3746_s25 + $0x2e8] sm:$0xff] }
  0x58   : > { %742 = vmatmul.mubr.f32.gmra.mrb[8].mxu1 %v259_v7  ;;  %971 = vmatprep.mubr.f32.mxu0 %v269_v8  ;;  %v322_v7 = vld [vmem:[%s3746_s25 + $0x2d8] sm:$0xff]  ;;  %v332_v8 = vld [vmem:[%s3746_s25 + $0x328] sm:$0xff] }
  0x59   : > { %746 = vmatprep.mubr.f32.mxu1 %v267_v10  ;;  %3175 = vmatpush1.bf16.msra.mxu0 %v3174_v9  ;;  %v3201_v9 = vpack.c.bf16 %v546_v5, %v545_v4  ;;  %v330_v10 = vld [vmem:[%s3746_s25 + $0x318] sm:$0xff]  ;;  %v421_v4 = vld [vmem:[%s3746_s25 + $0x5f0] sm:$0xff] }
  0x5a   : > { %3176 = vmatprep.subr.bf16.mxu0 %v3619_v3  ;;  %v422_v5 = vld [vmem:[%s3746_s25 + $0x5f8] sm:$0xff] }
  0x5b   : > { %972 = vmatmul.mubr.f32.gmra.mrb[10].mxu0 %v268_v13  ;;  %v331_v13 = vld [vmem:[%s3746_s25 + $0x320] sm:$0xff] }
  0x5c   : > { %747 = vmatmul.mubr.f32.gmra.mrb[10].mxu1 %v266_v14  ;;  %976 = vmatprep.mubr.f32.mxu0 %v276_v15  ;;  %v329_v14 = vld [vmem:[%s3746_s25 + $0x310] sm:$0xff]  ;;  %v339_v15 = vld [vmem:[%s3746_s25 + $0x360] sm:$0xff] }
  0x5d   : > { %751 = vmatprep.mubr.f32.mxu1 %v274_v17  ;;  %3178 = vmatpush1.bf16.msra.mxu0 %v3177_v16  ;;  %v3204_v16 = vpack.c.bf16 %v548_v12, %v547_v11  ;;  %v337_v17 = vld [vmem:[%s3746_s25 + $0x350] sm:$0xff]  ;;  %v435_v12 = vld [vmem:[%s3746_s25 + $0x660] sm:$0xff] }
  0x5e   : > { %3179 = vmatprep.subr.bf16.mxu0 %v3619_v3  ;;  %v437_v11 = vld [vmem:[%s3746_s25 + $0x670] sm:$0xff] }
  0x5f   : > { %977 = vmatmul.mubr.f32.gmra.mrb[12].mxu0 %v275_v20  ;;  %v338_v20 = vld [vmem:[%s3746_s25 + $0x358] sm:$0xff] }
  0x60   : > { %752 = vmatmul.mubr.f32.gmra.mrb[12].mxu1 %v273_v21  ;;  %981 = vmatprep.mubr.f32.mxu0 %v283_v22  ;;  %v336_v21 = vld [vmem:[%s3746_s25 + $0x348] sm:$0xff]  ;;  %v346_v22 = vld [vmem:[%s3746_s25 + $0x398] sm:$0xff] }
  0x61   : > { %756 = vmatprep.mubr.f32.mxu1 %v281_v24  ;;  %3181 = vmatpush1.bf16.msra.mxu0 %v3180_v23  ;;  %v3207_v23 = vpack.c.bf16 %v550_v19, %v549_v18  ;;  %v344_v24 = vld [vmem:[%s3746_s25 + $0x388] sm:$0xff]  ;;  %v441_v18 = vld [vmem:[%s3746_s25 + $0x690] sm:$0xff]  ;;  %v451_v19 = vld [vmem:[%s3746_s25 + $0x6e0] sm:$0xff] }
  0x62   : > { %3182 = vmatprep.subr.bf16.mxu0 %v3619_v3 }
  0x63   : > { %982 = vmatmul.mubr.f32.gmra.mrb[14].mxu0 %v282_v27  ;;  %v353_v27 = vld [vmem:[%s3746_s25 + $0x3d0] sm:$0xff] }
  0x64   : > { %757 = vmatmul.mubr.f32.gmra.mrb[14].mxu1 %v280_v28  ;;  %986 = vmatprep.mubr.f32.mxu0 %v290_v29  ;;  %v351_v28 = vld [vmem:[%s3746_s25 + $0x3c0] sm:$0xff]  ;;  %v352_v29 = vld [vmem:[%s3746_s25 + $0x3c8] sm:$0xff] }
  0x65   : > { %761 = vmatprep.mubr.f32.mxu1 %v288_v31  ;;  %3184 = vmatpush1.bf16.msra.mxu0 %v3183_v30  ;;  %v360_v30 = vld [vmem:[%s3746_s25 + $0x408] sm:$0xff]  ;;  %v358_v31 = vld [vmem:[%s3746_s25 + $0x3f8] sm:$0xff] }
  0x66   : > { %3185 = vmatprep.subr.bf16.mxu0 %v3619_v3 }
  0x67   : > { %987 = vmatmul.mubr.f32.gmra.mrb[16].mxu0 %v289_v34  ;;  %v367_v34 = vld [vmem:[%s3746_s25 + $0x440] sm:$0xff] }
  0x68   : > { %762 = vmatmul.mubr.f32.gmra.mrb[16].mxu1 %v287_v35  ;;  %991 = vmatprep.mubr.f32.mxu0 %v297_v36  ;;  %v365_v35 = vld [vmem:[%s3746_s25 + $0x430] sm:$0xff]  ;;  %v366_v36 = vld [vmem:[%s3746_s25 + $0x438] sm:$0xff] }
  0x69   : > { %766 = vmatprep.mubr.f32.mxu1 %v295_v38  ;;  %3187 = vmatpush1.bf16.msra.mxu0 %v3186_v37  ;;  %v364_v37 = vld [vmem:[%s3746_s25 + $0x428] sm:$0xff]  ;;  %v374_v38 = vld [vmem:[%s3746_s25 + $0x478] sm:$0xff] }
  0x6a   : > { %3188 = vmatprep.subr.bf16.mxu0 %v3619_v3 }
  0x6b   : > { %992 = vmatmul.mubr.f32.gmra.mrb[18].mxu0 %v296_v41  ;;  %v371_v41 = vld [vmem:[%s3746_s25 + $0x460] sm:$0xff] }
  0x6c   : > { %767 = vmatmul.mubr.f32.gmra.mrb[18].mxu1 %v294_v42  ;;  %996 = vmatprep.mubr.f32.mxu0 %v304_v43  ;;  %v381_v42 = vld [vmem:[%s3746_s25 + $0x4b0] sm:$0xff]  ;;  %v379_v43 = vld [vmem:[%s3746_s25 + $0x4a0] sm:$0xff] }
  0x6d   : > { %771 = vmatprep.mubr.f32.mxu1 %v302_v45  ;;  %3190 = vmatpush1.bf16.msra.mxu0 %v3189_v44  ;;  %v380_v44 = vld [vmem:[%s3746_s25 + $0x4a8] sm:$0xff]  ;;  %v378_v45 = vld [vmem:[%s3746_s25 + $0x498] sm:$0xff] }
  0x6e   : > { %3191 = vmatprep.subr.bf16.mxu0 %v3619_v3 }
  0x6f   : > { %997 = vmatmul.mubr.f32.gmra.mrb[20].mxu0 %v303_v48  ;;  %v387_v48 = vld [vmem:[%s3746_s25 + $0x4e0] sm:$0xff] }
  0x70   : > { %772 = vmatmul.mubr.f32.gmra.mrb[20].mxu1 %v301_v49  ;;  %1001 = vmatprep.mubr.f32.mxu0 %v311_v50  ;;  %v385_v49 = vld [vmem:[%s3746_s25 + $0x4d0] sm:$0xff]  ;;  %v395_v50 = vld [vmem:[%s3746_s25 + $0x520] sm:$0xff] }
  0x71   : > { %776 = vmatprep.mubr.f32.mxu1 %v309_v52  ;;  %3193 = vmatpush1.bf16.msra.mxu0 %v3192_v51  ;;  %v393_v51 = vld [vmem:[%s3746_s25 + $0x510] sm:$0xff]  ;;  %v394_v52 = vld [vmem:[%s3746_s25 + $0x518] sm:$0xff] }
  0x72   : > { %3194 = vmatprep.subr.bf16.mxu0 %v3619_v3 }
  0x73   : > { %1002 = vmatmul.mubr.f32.gmra.mrb[22].mxu0 %v310_v55  ;;  %v400_v55 = vld [vmem:[%s3746_s25 + $0x548] sm:$0xff] }
  0x74   : > { %777 = vmatmul.mubr.f32.gmra.mrb[22].mxu1 %v308_v56  ;;  %1006 = vmatprep.mubr.f32.mxu0 %v318_v57  ;;  %v401_v56 = vld [vmem:[%s3746_s25 + $0x550] sm:$0xff]  ;;  %v399_v57 = vld [vmem:[%s3746_s25 + $0x540] sm:$0xff] }
  0x75   : > { %781 = vmatprep.mubr.f32.mxu1 %v316_v59  ;;  %3196 = vmatpush1.bf16.msra.mxu0 %v3195_v58  ;;  %v409_v58 = vld [vmem:[%s3746_s25 + $0x590] sm:$0xff]  ;;  %v407_v59 = vld [vmem:[%s3746_s25 + $0x580] sm:$0xff] }
  0x76   : > { %3197 = vmatprep.subr.bf16.mxu0 %v3619_v3 }
  0x77   : > { %1007 = vmatmul.mubr.f32.gmra.mrb[24].mxu0 %v317_v62  ;;  %v416_v62 = vld [vmem:[%s3746_s25 + $0x5c8] sm:$0xff] }
  0x78   : > { %782 = vmatmul.mubr.f32.gmra.mrb[24].mxu1 %v315_v63  ;;  %1011 = vmatprep.mubr.f32.mxu0 %v325_v0  ;;  %v414_v63 = vld [vmem:[%s3746_s25 + $0x5b8] sm:$0xff]  ;;  %v415_v0 = vld [vmem:[%s3746_s25 + $0x5c0] sm:$0xff] }
  0x79   : > { %786 = vmatprep.mubr.f32.mxu1 %v323_v2  ;;  %3199 = vmatpush1.bf16.msra.mxu0 %v3198_v1  ;;  %v413_v1 = vld [vmem:[%s3746_s25 + $0x5b0] sm:$0xff]  ;;  %v423_v2 = vld [vmem:[%s3746_s25 + $0x600] sm:$0xff] }
  0x7a   : > { %3200 = vmatprep.subr.bf16.mxu0 %v3619_v3 }
  0x7b   : > { %1012 = vmatmul.mubr.f32.gmra.mrb[26].mxu0 %v324_v6  ;;  %v420_v6 = vld [vmem:[%s3746_s25 + $0x5e8] sm:$0xff] }
  0x7c   : > { %787 = vmatmul.mubr.f32.gmra.mrb[26].mxu1 %v322_v7  ;;  %1016 = vmatprep.mubr.f32.mxu0 %v332_v8  ;;  %v430_v7 = vld [vmem:[%s3746_s25 + $0x638] sm:$0xff]  ;;  %v428_v8 = vld [vmem:[%s3746_s25 + $0x628] sm:$0xff] }
  0x7d   : > { %791 = vmatprep.mubr.f32.mxu1 %v330_v10  ;;  %3202 = vmatpush1.bf16.msra.mxu0 %v3201_v9  ;;  %v429_v9 = vld [vmem:[%s3746_s25 + $0x630] sm:$0xff]  ;;  %v427_v10 = vld [vmem:[%s3746_s25 + $0x620] sm:$0xff] }
  0x7e   : > { %3203 = vmatprep.subr.bf16.mxu0 %v3619_v3 }
  0x7f   : > { %1017 = vmatmul.mubr.f32.gmra.mrb[28].mxu0 %v331_v13  ;;  %v436_v13 = vld [vmem:[%s3746_s25 + $0x668] sm:$0xff] }
  0x80   : > { %792 = vmatmul.mubr.f32.gmra.mrb[28].mxu1 %v329_v14  ;;  %1021 = vmatprep.mubr.f32.mxu0 %v339_v15  ;;  %v434_v14 = vld [vmem:[%s3746_s25 + $0x658] sm:$0xff]  ;;  %v444_v15 = vld [vmem:[%s3746_s25 + $0x6a8] sm:$0xff] }
  0x81   : > { %796 = vmatprep.mubr.f32.mxu1 %v337_v17  ;;  %3205 = vmatpush1.bf16.msra.mxu0 %v3204_v16  ;;  %v442_v16 = vld [vmem:[%s3746_s25 + $0x698] sm:$0xff]  ;;  %v443_v17 = vld [vmem:[%s3746_s25 + $0x6a0] sm:$0xff] }
  0x82   : > { %3206 = vmatprep.subr.bf16.mxu0 %v3619_v3  ;;  %v350_v3 = vld [vmem:[%s3746_s25 + $0x3b8] sm:$0xff] }
  0x83   : > { %1022 = vmatmul.mubr.f32.gmra.mrb[30].mxu0 %v338_v20  ;;  %v449_v20 = vld [vmem:[%s3746_s25 + $0x6d0] sm:$0xff] }
  0x84   : > { %797 = vmatmul.mubr.f32.gmra.mrb[30].mxu1 %v336_v21  ;;  %1026 = vmatprep.mubr.f32.mxu0 %v346_v22  ;;  %v450_v21 = vld [vmem:[%s3746_s25 + $0x6d8] sm:$0xff]  ;;  %v448_v22 = vld [vmem:[%s3746_s25 + $0x6c8] sm:$0xff] }
  0x85   : > { %801 = vmatprep.mubr.f32.mxu1 %v344_v24  ;;  %3208 = vmatpush1.bf16.msra.mxu0 %v3207_v23  ;;  %v236_v23 = vld [vmem:[%s3746_s25 + $0x28] sm:$0xff]  ;;  %v237_v24 = vld [vmem:[%s3746_s25 + $0x30] sm:$0xff] }
  0x87   : > { %1027 = vmatmul.mubr.f32.gmra.mrb[32].mxu0 %v345_v25  ;;  %v235_v25 = vld [vmem:[%s3746_s25 + $0x20] sm:$0xff] }
  0x88   : > { %802 = vmatmul.mubr.f32.gmra.mrb[32].mxu1 %v343_v26  ;;  %1031 = vmatprep.mubr.f32.mxu0 %v353_v27  ;;  %v244_v26 = vld [vmem:[%s3746_s25 + $0x68] sm:$0xff]  ;;  %v243_v27 = vld [vmem:[%s3746_s25 + $0x60] sm:$0xff] }
  0x89   : > { %806 = vmatprep.mubr.f32.mxu1 %v351_v28  ;;  %v251_v28 = vld [vmem:[%s3746_s25 + $0xa0] sm:$0xff] }
  0x8b   : > { %1032 = vmatmul.mubr.f32.gmra.mrb[34].mxu0 %v352_v29  ;;  %v242_v29 = vld [vmem:[%s3746_s25 + $0x58] sm:$0xff] }
  0x8c   : > { %807 = vmatmul.mubr.f32.gmra.mrb[34].mxu1 %v350_v3  ;;  %1036 = vmatprep.mubr.f32.mxu0 %v360_v30  ;;  %v250_v3 = vld [vmem:[%s3746_s25 + $0x98] sm:$0xff] }
  0x8d   : > { %811 = vmatprep.mubr.f32.mxu1 %v358_v31  ;;  %v258_v30 = vld [vmem:[%s3746_s25 + $0xd8] sm:$0xff]  ;;  %v265_v31 = vld [vmem:[%s3746_s25 + $0x110] sm:$0xff] }
  0x8f   : > { %1037 = vmatmul.mubr.f32.gmra.mrb[36].mxu0 %v359_v32  ;;  %v249_v32 = vld [vmem:[%s3746_s25 + $0x90] sm:$0xff] }
  0x90   : > { %812 = vmatmul.mubr.f32.gmra.mrb[36].mxu1 %v357_v33  ;;  %1041 = vmatprep.mubr.f32.mxu0 %v367_v34  ;;  %v257_v33 = vld [vmem:[%s3746_s25 + $0xd0] sm:$0xff]  ;;  %v272_v34 = vld [vmem:[%s3746_s25 + $0x148] sm:$0xff] }
  0x91   : > { %816 = vmatprep.mubr.f32.mxu1 %v365_v35  ;;  %v279_v35 = vld [vmem:[%s3746_s25 + $0x180] sm:$0xff] }
  0x93   : > { %1042 = vmatmul.mubr.f32.gmra.mrb[38].mxu0 %v366_v36  ;;  %v256_v36 = vld [vmem:[%s3746_s25 + $0xc8] sm:$0xff] }
  0x94   : > { %817 = vmatmul.mubr.f32.gmra.mrb[38].mxu1 %v364_v37  ;;  %1046 = vmatprep.mubr.f32.mxu0 %v374_v38  ;;  %v264_v37 = vld [vmem:[%s3746_s25 + $0x108] sm:$0xff]  ;;  %v286_v38 = vld [vmem:[%s3746_s25 + $0x1b8] sm:$0xff] }
  0x95   : > { %821 = vmatprep.mubr.f32.mxu1 %v372_v39  ;;  %v293_v39 = vld [vmem:[%s3746_s25 + $0x1f0] sm:$0xff] }
  0x97   : > { %1047 = vmatmul.mubr.f32.gmra.mrb[40].mxu0 %v373_v40  ;;  %v263_v40 = vld [vmem:[%s3746_s25 + $0x100] sm:$0xff] }
  0x98   : > { %822 = vmatmul.mubr.f32.gmra.mrb[40].mxu1 %v371_v41  ;;  %1051 = vmatprep.mubr.f32.mxu0 %v381_v42  ;;  %v271_v41 = vld [vmem:[%s3746_s25 + $0x140] sm:$0xff]  ;;  %v300_v42 = vld [vmem:[%s3746_s25 + $0x228] sm:$0xff] }
  0x99   : > { %826 = vmatprep.mubr.f32.mxu1 %v379_v43  ;;  %v307_v43 = vld [vmem:[%s3746_s25 + $0x260] sm:$0xff] }
  0x9b   : > { %1052 = vmatmul.mubr.f32.gmra.mrb[42].mxu0 %v380_v44  ;;  %v270_v44 = vld [vmem:[%s3746_s25 + $0x138] sm:$0xff] }
  0x9c   : > { %827 = vmatmul.mubr.f32.gmra.mrb[42].mxu1 %v378_v45  ;;  %1056 = vmatprep.mubr.f32.mxu0 %v388_v46  ;;  %v278_v45 = vld [vmem:[%s3746_s25 + $0x178] sm:$0xff] }
  0x9d   : > { %831 = vmatprep.mubr.f32.mxu1 %v386_v47  ;;  %v314_v46 = vld [vmem:[%s3746_s25 + $0x298] sm:$0xff]  ;;  %v321_v47 = vld [vmem:[%s3746_s25 + $0x2d0] sm:$0xff] }
  0x9f   : > { %1057 = vmatmul.mubr.f32.gmra.mrb[44].mxu0 %v387_v48  ;;  %v277_v48 = vld [vmem:[%s3746_s25 + $0x170] sm:$0xff] }
  0xa0   : > { %832 = vmatmul.mubr.f32.gmra.mrb[44].mxu1 %v385_v49  ;;  %1061 = vmatprep.mubr.f32.mxu0 %v395_v50  ;;  %v285_v49 = vld [vmem:[%s3746_s25 + $0x1b0] sm:$0xff]  ;;  %v328_v50 = vld [vmem:[%s3746_s25 + $0x308] sm:$0xff] }
  0xa1   : > { %836 = vmatprep.mubr.f32.mxu1 %v393_v51  ;;  %v335_v51 = vld [vmem:[%s3746_s25 + $0x340] sm:$0xff] }
  0xa3   : > { %1062 = vmatmul.mubr.f32.gmra.mrb[46].mxu0 %v394_v52  ;;  %v284_v52 = vld [vmem:[%s3746_s25 + $0x1a8] sm:$0xff] }
  0xa4   : > { %837 = vmatmul.mubr.f32.gmra.mrb[46].mxu1 %v392_v53  ;;  %1066 = vmatprep.mubr.f32.mxu0 %v402_v54  ;;  %v292_v53 = vld [vmem:[%s3746_s25 + $0x1e8] sm:$0xff]  ;;  %v342_v54 = vld [vmem:[%s3746_s25 + $0x378] sm:$0xff] }
  0xa5   : > { %841 = vmatprep.mubr.f32.mxu1 %v400_v55  ;;  %v349_v55 = vld [vmem:[%s3746_s25 + $0x3b0] sm:$0xff] }
  0xa7   : > { %1067 = vmatmul.mubr.f32.gmra.mrb[48].mxu0 %v401_v56  ;;  %v291_v56 = vld [vmem:[%s3746_s25 + $0x1e0] sm:$0xff] }
  0xa8   : > { %842 = vmatmul.mubr.f32.gmra.mrb[48].mxu1 %v399_v57  ;;  %1071 = vmatprep.mubr.f32.mxu0 %v409_v58  ;;  %v299_v57 = vld [vmem:[%s3746_s25 + $0x220] sm:$0xff]  ;;  %v356_v58 = vld [vmem:[%s3746_s25 + $0x3e8] sm:$0xff] }
  0xa9   : > { %846 = vmatprep.mubr.f32.mxu1 %v407_v59  ;;  %v363_v59 = vld [vmem:[%s3746_s25 + $0x420] sm:$0xff] }
  0xab   : > { %1072 = vmatmul.mubr.f32.gmra.mrb[50].mxu0 %v408_v60  ;;  %v298_v60 = vld [vmem:[%s3746_s25 + $0x218] sm:$0xff] }
  0xac   : > { %847 = vmatmul.mubr.f32.gmra.mrb[50].mxu1 %v406_v61  ;;  %1076 = vmatprep.mubr.f32.mxu0 %v416_v62  ;;  %v306_v61 = vld [vmem:[%s3746_s25 + $0x258] sm:$0xff] }
  0xad   : > { %851 = vmatprep.mubr.f32.mxu1 %v414_v63  ;;  %v370_v62 = vld [vmem:[%s3746_s25 + $0x458] sm:$0xff]  ;;  %v377_v63 = vld [vmem:[%s3746_s25 + $0x490] sm:$0xff] }
  0xaf   : > { %1077 = vmatmul.mubr.f32.gmra.mrb[52].mxu0 %v415_v0  ;;  %v305_v0 = vld [vmem:[%s3746_s25 + $0x250] sm:$0xff] }
  0xb0   : > { %852 = vmatmul.mubr.f32.gmra.mrb[52].mxu1 %v413_v1  ;;  %1081 = vmatprep.mubr.f32.mxu0 %v423_v2  ;;  %v313_v1 = vld [vmem:[%s3746_s25 + $0x290] sm:$0xff]  ;;  %v384_v2 = vld [vmem:[%s3746_s25 + $0x4c8] sm:$0xff] }
  0xb1   : > { %856 = vmatprep.mubr.f32.mxu1 %v421_v4  ;;  %v391_v4 = vld [vmem:[%s3746_s25 + $0x500] sm:$0xff] }
  0xb3   : > { %1082 = vmatmul.mubr.f32.gmra.mrb[54].mxu0 %v422_v5  ;;  %v312_v5 = vld [vmem:[%s3746_s25 + $0x288] sm:$0xff] }
  0xb4   : > { %857 = vmatmul.mubr.f32.gmra.mrb[54].mxu1 %v420_v6  ;;  %1086 = vmatprep.mubr.f32.mxu0 %v430_v7  ;;  %v320_v6 = vld [vmem:[%s3746_s25 + $0x2c8] sm:$0xff]  ;;  %v398_v7 = vld [vmem:[%s3746_s25 + $0x538] sm:$0xff] }
  0xb5   : > { %861 = vmatprep.mubr.f32.mxu1 %v428_v8  ;;  %v405_v8 = vld [vmem:[%s3746_s25 + $0x570] sm:$0xff] }
  0xb7   : > { %1087 = vmatmul.mubr.f32.gmra.mrb[56].mxu0 %v429_v9  ;;  %v319_v9 = vld [vmem:[%s3746_s25 + $0x2c0] sm:$0xff] }
  0xb8   : > { %862 = vmatmul.mubr.f32.gmra.mrb[56].mxu1 %v427_v10  ;;  %1091 = vmatprep.mubr.f32.mxu0 %v437_v11  ;;  %v327_v10 = vld [vmem:[%s3746_s25 + $0x300] sm:$0xff]  ;;  %v412_v11 = vld [vmem:[%s3746_s25 + $0x5a8] sm:$0xff] }
  0xb9   : > { %866 = vmatprep.mubr.f32.mxu1 %v435_v12  ;;  %v419_v12 = vld [vmem:[%s3746_s25 + $0x5e0] sm:$0xff] }
  0xbb   : > { %1092 = vmatmul.mubr.f32.gmra.mrb[58].mxu0 %v436_v13  ;;  %v326_v13 = vld [vmem:[%s3746_s25 + $0x2f8] sm:$0xff] }
  0xbc   : > { %867 = vmatmul.mubr.f32.gmra.mrb[58].mxu1 %v434_v14  ;;  %1096 = vmatprep.mubr.f32.mxu0 %v444_v15  ;;  %v334_v14 = vld [vmem:[%s3746_s25 + $0x338] sm:$0xff] }
  0xbd   : > { %871 = vmatprep.mubr.f32.mxu1 %v442_v16  ;;  %v426_v15 = vld [vmem:[%s3746_s25 + $0x618] sm:$0xff]  ;;  %v433_v16 = vld [vmem:[%s3746_s25 + $0x650] sm:$0xff] }
  0xbf   : > { %1097 = vmatmul.mubr.f32.gmra.mrb[60].mxu0 %v443_v17  ;;  %v333_v17 = vld [vmem:[%s3746_s25 + $0x330] sm:$0xff] }
  0xc0   : > { %872 = vmatmul.mubr.f32.gmra.mrb[60].mxu1 %v441_v18  ;;  %1101 = vmatprep.mubr.f32.mxu0 %v451_v19  ;;  %v341_v18 = vld [vmem:[%s3746_s25 + $0x370] sm:$0xff]  ;;  %v440_v19 = vld [vmem:[%s3746_s25 + $0x688] sm:$0xff] }
  0xc1   : > { %876 = vmatprep.mubr.f32.mxu1 %v449_v20  ;;  %v447_v20 = vld [vmem:[%s3746_s25 + $0x6c0] sm:$0xff] }
  0xc3   : > { %1102 = vmatmul.mubr.f32.gmra.mrb[62].mxu0 %v450_v21  ;;  %v340_v21 = vld [vmem:[%s3746_s25 + $0x368] sm:$0xff] }
  0xc4   : > { %877 = vmatmul.mubr.f32.gmra.mrb[62].mxu1 %v448_v22  ;;  %1171 = vmatprep.mubr.f32.mxu0 %v236_v23  ;;  %v348_v22 = vld [vmem:[%s3746_s25 + $0x3a8] sm:$0xff]  ;;  %v454_v23 = vld [vmem:[%s3746_s25 + $0x6f8] sm:$0xff] }
  0xc5   : > { %2963 = vmatprep.mubr.msk.f32.mxu1 %vm560_vm0, %v237_v24  ;;  %v347_v24 = vld [vmem:[%s3746_s25 + $0x3a0] sm:$0xff] }
  0xc7   : > { %1172 = vmatmul.mubr.f32.vlgmr.msra.gmra.mrb[0].mxu0 %v235_v25  ;;  %v355_v25 = vld [vmem:[%s3746_s25 + $0x3e0] sm:$0xff] }
  0xc8   : > { %2964 = vmatmul.mubr.msk.f32.vlgmr.msra.gmra.mrb[64].mxu1 %vm560_vm0, %v244_v26  ;;  %1176 = vmatprep.mubr.f32.mxu0 %v243_v27  ;;  %v354_v26 = vld [vmem:[%s3746_s25 + $0x3d8] sm:$0xff] }
  0xc9   : > { %2966 = vmatprep.mubr.msk.f32.mxu1 %vm560_vm0, %v251_v28  ;;  %v362_v27 = vld [vmem:[%s3746_s25 + $0x418] sm:$0xff]  ;;  %v361_v28 = vld [vmem:[%s3746_s25 + $0x410] sm:$0xff] }
  0xcb   : > { %1177 = vmatmul.mubr.f32.gmra.mrb[2].mxu0 %v242_v29  ;;  %v369_v29 = vld [vmem:[%s3746_s25 + $0x450] sm:$0xff] }
  0xcc   : > { %1181 = vmatprep.mubr.f32.mxu0 %v250_v3  ;;  %2967 = vmatmul.mubr.msk.f32.gmra.mrb[66].mxu1 %vm560_vm0, %v258_v30  ;;  %v368_v3 = vld [vmem:[%s3746_s25 + $0x448] sm:$0xff] }
  0xcd   : > { %2969 = vmatprep.mubr.msk.f32.mxu1 %vm560_vm0, %v265_v31  ;;  %v376_v30 = vld [vmem:[%s3746_s25 + $0x488] sm:$0xff]  ;;  %v375_v31 = vld [vmem:[%s3746_s25 + $0x480] sm:$0xff] }
  0xcf   : > { %1182 = vmatmul.mubr.f32.gmra.mrb[4].mxu0 %v249_v32  ;;  %v383_v32 = vld [vmem:[%s3746_s25 + $0x4c0] sm:$0xff] }
  0xd0   : > { %1186 = vmatprep.mubr.f32.mxu0 %v257_v33  ;;  %2970 = vmatmul.mubr.msk.f32.gmra.mrb[68].mxu1 %vm560_vm0, %v272_v34  ;;  %v382_v33 = vld [vmem:[%s3746_s25 + $0x4b8] sm:$0xff] }
  0xd1   : > { %2972 = vmatprep.mubr.msk.f32.mxu1 %vm560_vm0, %v279_v35  ;;  %v390_v34 = vld [vmem:[%s3746_s25 + $0x4f8] sm:$0xff] }
  0xd3   : > { %1187 = vmatmul.mubr.f32.gmra.mrb[6].mxu0 %v256_v36  ;;  %v389_v36 = vld [vmem:[%s3746_s25 + $0x4f0] sm:$0xff] }
  0xd4   : > { %1191 = vmatprep.mubr.f32.mxu0 %v264_v37  ;;  %2973 = vmatmul.mubr.msk.f32.gmra.mrb[70].mxu1 %vm560_vm0, %v286_v38  ;;  %v397_v38 = vld [vmem:[%s3746_s25 + $0x530] sm:$0xff] }
  0xd5   : > { %2975 = vmatprep.mubr.msk.f32.mxu1 %vm560_vm0, %v293_v39 }
  0xd7   : > { %1192 = vmatmul.mubr.f32.gmra.mrb[8].mxu0 %v263_v40  ;;  %v396_v40 = vld [vmem:[%s3746_s25 + $0x528] sm:$0xff] }
  0xd8   : > { %1196 = vmatprep.mubr.f32.mxu0 %v271_v41  ;;  %2976 = vmatmul.mubr.msk.f32.gmra.mrb[72].mxu1 %vm560_vm0, %v300_v42  ;;  %v404_v42 = vld [vmem:[%s3746_s25 + $0x568] sm:$0xff] }
  0xd9   : > { %2978 = vmatprep.mubr.msk.f32.mxu1 %vm560_vm0, %v307_v43 }
  0xdb   : > { %1197 = vmatmul.mubr.f32.gmra.mrb[10].mxu0 %v270_v44  ;;  %v403_v44 = vld [vmem:[%s3746_s25 + $0x560] sm:$0xff] }
  0xdc   : > { %1201 = vmatprep.mubr.f32.mxu0 %v278_v45  ;;  %2979 = vmatmul.mubr.msk.f32.gmra.mrb[74].mxu1 %vm560_vm0, %v314_v46  ;;  %v411_v46 = vld [vmem:[%s3746_s25 + $0x5a0] sm:$0xff] }
  0xdd   : > { %2981 = vmatprep.mubr.msk.f32.mxu1 %vm560_vm0, %v321_v47 }
  0xdf   : > { %1202 = vmatmul.mubr.f32.gmra.mrb[12].mxu0 %v277_v48  ;;  %v410_v48 = vld [vmem:[%s3746_s25 + $0x598] sm:$0xff] }
  0xe0   : > { %1206 = vmatprep.mubr.f32.mxu0 %v285_v49  ;;  %2982 = vmatmul.mubr.msk.f32.gmra.mrb[76].mxu1 %vm560_vm0, %v328_v50  ;;  %v418_v50 = vld [vmem:[%s3746_s25 + $0x5d8] sm:$0xff] }
  0xe1   : > { %2984 = vmatprep.mubr.msk.f32.mxu1 %vm560_vm0, %v335_v51 }
  0xe3   : > { %1207 = vmatmul.mubr.f32.gmra.mrb[14].mxu0 %v284_v52  ;;  %v417_v52 = vld [vmem:[%s3746_s25 + $0x5d0] sm:$0xff] }
  0xe4   : > { %1211 = vmatprep.mubr.f32.mxu0 %v292_v53  ;;  %2985 = vmatmul.mubr.msk.f32.gmra.mrb[78].mxu1 %vm560_vm0, %v342_v54  ;;  %v425_v54 = vld [vmem:[%s3746_s25 + $0x610] sm:$0xff] }
  0xe5   : > { %2987 = vmatprep.mubr.msk.f32.mxu1 %vm560_vm0, %v349_v55 }
  0xe7   : > { %1212 = vmatmul.mubr.f32.gmra.mrb[16].mxu0 %v291_v56  ;;  %v424_v56 = vld [vmem:[%s3746_s25 + $0x608] sm:$0xff] }
  0xe8   : > { %1216 = vmatprep.mubr.f32.mxu0 %v299_v57  ;;  %2988 = vmatmul.mubr.msk.f32.gmra.mrb[80].mxu1 %vm560_vm0, %v356_v58  ;;  %v432_v58 = vld [vmem:[%s3746_s25 + $0x648] sm:$0xff] }
  0xe9   : > { %2990 = vmatprep.mubr.msk.f32.mxu1 %vm560_vm0, %v363_v59 }
  0xeb   : > { %1217 = vmatmul.mubr.f32.gmra.mrb[18].mxu0 %v298_v60  ;;  %v431_v60 = vld [vmem:[%s3746_s25 + $0x640] sm:$0xff] }
  0xec   : > { %1221 = vmatprep.mubr.f32.mxu0 %v306_v61  ;;  %2991 = vmatmul.mubr.msk.f32.gmra.mrb[82].mxu1 %vm560_vm0, %v370_v62  ;;  %v1749_v62 = vld [vmem:[%s4828_s3] sm:$0xff] }
  0xed   : > { %2993 = vmatprep.mubr.msk.f32.mxu1 %vm560_vm0, %v377_v63  ;;  %v1750_v63 = vld [vmem:[%s4828_s3 + $0x8] sm:$0xff] }
  0xef   : > { %1222 = vmatmul.mubr.f32.gmra.mrb[20].mxu0 %v305_v0  ;;  %v439_v0 = vld [vmem:[%s3746_s25 + $0x680] sm:$0xff] }
  0xf0   : > { %1226 = vmatprep.mubr.f32.mxu0 %v313_v1  ;;  %2994 = vmatmul.mubr.msk.f32.gmra.mrb[84].mxu1 %vm560_vm0, %v384_v2  ;;  %v3213_v1 = vpack.c.bf16 %v1750_v63, %v1749_v62  ;;  %v4338_v63 = vld [vmem:[%s4827_s2] ss:$0 sm:$0xff] }
  0xf1   : > { %2996 = vmatprep.mubr.msk.f32.mxu1 %vm560_vm0, %v391_v4  ;;  %v438_v4 = vld [vmem:[%s3746_s25 + $0x678] sm:$0xff] }
  0xf2   : > { %3214 = vmatprep.subr.bf16.mxu1 %v3213_v1 }
  0xf3   : > { %1227 = vmatmul.mubr.f32.gmra.mrb[22].mxu0 %v312_v5  ;;  %3216 = vmatpush3.bf16.msra.mxu1 %v3213_v1 }
  0xf4   : > { %1231 = vmatprep.mubr.f32.mxu0 %v320_v6  ;;  %2997 = vmatmul.mubr.msk.f32.gmra.mrb[86].mxu1 %vm560_vm0, %v398_v7  ;;  %v446_v6 = vld [vmem:[%s3746_s25 + $0x6b8] sm:$0xff]  ;;  %v1751_v7 = vld [vmem:[%s4828_s3 + $0x10] sm:$0xf] }
  0xf5   : > { %2999 = vmatprep.mubr.msk.f32.mxu1 %vm560_vm0, %v405_v8  ;;  %3015 = vmatprep.subr.msk.mxu1 %vm1856_vm1, %v1751_v7 }
  0xf7   : > { %1232 = vmatmul.mubr.f32.gmra.mrb[24].mxu0 %v319_v9  ;;  %v445_v9 = vld [vmem:[%s3746_s25 + $0x6b0] sm:$0xff]  ;;  %3016 = vmatpush3.msk.msra.mxu1 %vm1856_vm1, %v1751_v7 }
  0xf8   : > { %1236 = vmatprep.mubr.f32.mxu0 %v327_v10  ;;  %3000 = vmatmul.mubr.msk.f32.gmra.mrb[88].mxu1 %vm560_vm0, %v412_v11  ;;  %v453_v11 = vld [vmem:[%s3746_s25 + $0x6f0] sm:$0xff] }
  0xf9   : > { %3002 = vmatprep.mubr.msk.f32.mxu1 %vm560_vm0, %v419_v12 }
  0xfb   : > { %1237 = vmatmul.mubr.f32.gmra.mrb[26].mxu0 %v326_v13  ;;  %v452_v13 = vld [vmem:[%s3746_s25 + $0x6e8] sm:$0xff] }
  0xfc   : > { %1241 = vmatprep.mubr.f32.mxu0 %v334_v14  ;;  %3003 = vmatmul.mubr.msk.f32.gmra.mrb[90].mxu1 %vm560_vm0, %v426_v15 }
  0xfd   : > { %3005 = vmatprep.mubr.msk.f32.mxu1 %vm560_vm0, %v433_v16 }
  0xff   : > { %1242 = vmatmul.mubr.f32.gmra.mrb[28].mxu0 %v333_v17 }
 0x100   : > { %1246 = vmatprep.mubr.f32.mxu0 %v341_v18  ;;  %3006 = vmatmul.mubr.msk.f32.gmra.mrb[92].mxu1 %vm560_vm0, %v440_v19 }
 0x101   : > { %3008 = vmatprep.mubr.msk.f32.mxu1 %vm560_vm0, %v447_v20 }
 0x103   : > { %1247 = vmatmul.mubr.f32.gmra.mrb[30].mxu0 %v340_v21 }
 0x104   : > { %1251 = vmatprep.mubr.f32.mxu0 %v348_v22  ;;  %3009 = vmatmul.mubr.msk.f32.gmra.mrb[94].mxu1 %vm560_vm0, %v454_v23 }
 0x107   : > { %1252 = vmatmul.mubr.f32.gmra.mrb[32].mxu0 %v347_v24 }
 0x108   : > { %1256 = vmatprep.mubr.f32.mxu0 %v355_v25 }
 0x10b   : > { %1257 = vmatmul.mubr.f32.gmra.mrb[34].mxu0 %v354_v26 }
 0x10c   : > { %1261 = vmatprep.mubr.f32.mxu0 %v362_v27 }
 0x10f   : > { %1262 = vmatmul.mubr.f32.gmra.mrb[36].mxu0 %v361_v28 }
 0x110   : > { %1266 = vmatprep.mubr.f32.mxu0 %v369_v29 }
 0x113   : > { %1267 = vmatmul.mubr.f32.gmra.mrb[38].mxu0 %v368_v3 }
 0x114   : > { %1271 = vmatprep.mubr.f32.mxu0 %v376_v30 }
 0x117   : > { %1272 = vmatmul.mubr.f32.gmra.mrb[40].mxu0 %v375_v31 }
 0x118   : > { %1276 = vmatprep.mubr.f32.mxu0 %v383_v32 }
 0x11b   : > { %1277 = vmatmul.mubr.f32.gmra.mrb[42].mxu0 %v382_v33  ;;  %v4245_v35 = vpop.f32.mrb[0].mxu1 }
 0x11c   : > { %1281 = vmatprep.mubr.f32.mxu0 %v390_v34  ;;  %v725_v37 = vpop.f32.mrb[1].mxu1 }
 0x11f   : > { %1282 = vmatmul.mubr.f32.gmra.mrb[44].mxu0 %v389_v36  ;;  %v4249_v39 = vpop.f32.mrb[2].mxu1 }
 0x120   : > { %1286 = vmatprep.mubr.f32.mxu0 %v397_v38  ;;  %v730_v41 = vpop.f32.mrb[3].mxu1 }
 0x123   : > { %1287 = vmatmul.mubr.f32.gmra.mrb[46].mxu0 %v396_v40  ;;  %v4253_v43 = vpop.f32.mrb[4].mxu1 }
 0x124   : > { %1291 = vmatprep.mubr.f32.mxu0 %v404_v42  ;;  %v735_v45 = vpop.f32.mrb[5].mxu1 }
 0x127   : > { %1292 = vmatmul.mubr.f32.gmra.mrb[48].mxu0 %v403_v44  ;;  %v4257_v47 = vpop.f32.mrb[6].mxu1 }
 0x128   : > { %1296 = vmatprep.mubr.f32.mxu0 %v411_v46  ;;  %v740_v49 = vpop.f32.mrb[7].mxu1 }
 0x12b   : > { %1297 = vmatmul.mubr.f32.gmra.mrb[50].mxu0 %v410_v48  ;;  %v4261_v51 = vpop.f32.mrb[8].mxu1 }
 0x12c   : > { %1301 = vmatprep.mubr.f32.mxu0 %v418_v50  ;;  %v745_v53 = vpop.f32.mrb[9].mxu1 }
 0x12f   : > { %1302 = vmatmul.mubr.f32.gmra.mrb[52].mxu0 %v417_v52  ;;  %v4265_v55 = vpop.f32.mrb[10].mxu1 }
 0x130   : > { %1306 = vmatprep.mubr.f32.mxu0 %v425_v54  ;;  %v750_v57 = vpop.f32.mrb[11].mxu1 }
 0x133   : > { %1307 = vmatmul.mubr.f32.gmra.mrb[54].mxu0 %v424_v56  ;;  %v4269_v59 = vpop.f32.mrb[12].mxu1 }
 0x134   : > { %1311 = vmatprep.mubr.f32.mxu0 %v432_v58  ;;  %v755_v61 = vpop.f32.mrb[13].mxu1 }
 0x137   : > { %1312 = vmatmul.mubr.f32.gmra.mrb[56].mxu0 %v431_v60  ;;  %v4279_v2 = vpop.f32.mrb[14].mxu1 }
 0x138   : > { %1316 = vmatprep.mubr.f32.mxu0 %v439_v0  ;;  %v760_v5 = vpop.f32.mrb[15].mxu1 }
 0x13b   : > { %1317 = vmatmul.mubr.f32.gmra.mrb[58].mxu0 %v438_v4  ;;  %v4286_v8 = vpop.f32.mrb[16].mxu1  ;;  %v724_v4 = vadd.f32 %v4338_v63, %v4245_v35 }
 0x13c   : > { %1321 = vmatprep.mubr.f32.mxu0 %v446_v6  ;;  %v765_v10 = vpop.f32.mrb[17].mxu1 }
 0x13f   : > { %1322 = vmatmul.mubr.f32.gmra.mrb[60].mxu0 %v445_v9  ;;  %v4290_v12 = vpop.f32.mrb[18].mxu1 }
 0x140   : > { %1326 = vmatprep.mubr.f32.mxu0 %v453_v11  ;;  %v770_v14 = vpop.f32.mrb[19].mxu1  ;;  %v729_v11 = vadd.f32 %v4338_v63, %v4249_v39  ;;  %v739_v39 = vadd.f32 %v4338_v63, %v4257_v47 }
 0x143   : > { %1327 = vmatmul.mubr.f32.gmra.mrb[62].mxu0 %v452_v13  ;;  %v4293_v15 = vpop.f32.mrb[20].mxu1 }
 0x144   : > { %v775_v16 = vpop.f32.mrb[21].mxu1 }
 0x147   : > { %v4295_v17 = vpop.f32.mrb[22].mxu1 }
 0x148   : > { %v780_v18 = vpop.f32.mrb[23].mxu1 }
 0x14b   : > { %v4297_v19 = vpop.f32.mrb[24].mxu1 }
 0x14c   : > { %v785_v20 = vpop.f32.mrb[25].mxu1 }
 0x14f   : > { %v4299_v21 = vpop.f32.mrb[26].mxu1 }
 0x150   : > { %v790_v22 = vpop.f32.mrb[27].mxu1 }
 0x153   : > { %v4301_v23 = vpop.f32.mrb[28].mxu1 }
 0x154   : > { %v795_v24 = vpop.f32.mrb[29].mxu1 }
 0x157   : > { %v4303_v25 = vpop.f32.mrb[30].mxu1 }
 0x158   : > { %v800_v26 = vpop.f32.mrb[31].mxu1 }
 0x159   : > { %v734_v26 = vadd.f32 %v4338_v63, %v4253_v43  ;;  %v744_v43 = vadd.f32 %v4338_v63, %v4261_v51 }
 0x15b   : > { %v4305_v27 = vpop.f32.mrb[32].mxu1 }
 0x15c   : > { %v805_v28 = vpop.f32.mrb[33].mxu1 }
 0x15f   : > { %v4307_v29 = vpop.f32.mrb[34].mxu1 }
 0x160   : > { %v810_v3 = vpop.f32.mrb[35].mxu1 }
 0x163   : > { %v4309_v30 = vpop.f32.mrb[36].mxu1 }
 0x164   : > { %v815_v31 = vpop.f32.mrb[37].mxu1 }
 0x167   : > { %v4311_v32 = vpop.f32.mrb[38].mxu1 }
 0x168   : > { %v820_v33 = vpop.f32.mrb[39].mxu1 }
 0x16b   : > { %v4313_v34 = vpop.f32.mrb[40].mxu1 }
 0x16c   : > { %v825_v36 = vpop.f32.mrb[41].mxu1 }
 0x16f   : > { %v4315_v37 = vpop.f32.mrb[42].mxu1 }
 0x170   : > { %v830_v38 = vpop.f32.mrb[43].mxu1 }
 0x173   : > { %v4317_v40 = vpop.f32.mrb[44].mxu1 }
 0x174   : > { %v835_v41 = vpop.f32.mrb[45].mxu1 }
 0x177   : > { %v4319_v42 = vpop.f32.mrb[46].mxu1 }
 0x178   : > { %v840_v44 = vpop.f32.mrb[47].mxu1 }
 0x17b   : > { %v4321_v45 = vpop.f32.mrb[48].mxu1 }
 0x17c   : > { %v845_v46 = vpop.f32.mrb[49].mxu1 }
 0x17f   : > { %v4323_v48 = vpop.f32.mrb[50].mxu1 }
 0x180   : > { %v850_v49 = vpop.f32.mrb[51].mxu1 }
 0x183   : > { %v4325_v50 = vpop.f32.mrb[52].mxu1 }
 0x184   : > { %v855_v52 = vpop.f32.mrb[53].mxu1 }
 0x187   : > { %v4327_v53 = vpop.f32.mrb[54].mxu1 }
 0x188   : > { %v860_v54 = vpop.f32.mrb[55].mxu1 }
 0x18b   : > { %v4329_v56 = vpop.f32.mrb[56].mxu1 }
 0x18c   : > { %v865_v57 = vpop.f32.mrb[57].mxu1 }
 0x18f   : > { %v4331_v58 = vpop.f32.mrb[58].mxu1 }
 0x190   : > { %v870_v60 = vpop.f32.mrb[59].mxu1 }
 0x193   : > { %v4333_v61 = vpop.f32.mrb[60].mxu1 }
 0x194   : > { %v875_v62 = vpop.f32.mrb[61].mxu1 }
 0x197   : > { %v4340_v0 = vpop.f32.mrb[62].mxu1 }
 0x198   : > { %v880_v1 = vpop.f32.mrb[63].mxu1 }
 0x19a   : > { %v1173_v5 = vpop.f32.mrb[0].mxu0 }
 0x19b   : > { %v3218_v6 = vadd.f32 %v1173_v5, %v724_v4  ;;  %v1175_v7 = vpop.f32.mrb[1].mxu0  ;;  %v2965_v9 = vpop.f32.mrb[64].mxu1 }
 0x19c   : > { %v1398_v10 = vpop.f32.mrb[65].mxu1 }
 0x19d   : > { %v1399_v13 = vadd.f32 %v3218_v6, %v1398_v10  ;;  %v749_v10 = vadd.f32 %v4338_v63, %v4265_v55 }
 0x19e   : > { %v1178_v14 = vpop.f32.mrb[2].mxu0 }
 0x19f   : > { %v2663_v16 = vmul.f32 -1.442695, %v1399_v13  ;;  %v3220_v18 = vadd.f32 %v1178_v14, %v729_v11  ;;  %v1180_v20 = vpop.f32.mrb[3].mxu0  ;;  %v2968_v22 = vpop.f32.mrb[66].mxu1 }
 0x1a0   : > { %v1408_v24 = vpop.f32.mrb[67].mxu1 }
 0x1a1   : > { %3355 = vpow2.f32 %v2663_v16  ;;  %v1404_v35 = vadd.f32 %v3220_v18, %v2965_v9 }
 0x1a2   : > { %v1183_v28 = vpop.f32.mrb[4].mxu0 }
 0x1a3   : > { %v2664_v3 = vmul.f32 -1.442695, %v1404_v35  ;;  %v3222_v31 = vadd.f32 %v1183_v28, %v734_v26  ;;  %v1185_v33 = vpop.f32.mrb[5].mxu0  ;;  %v2971_v36 = vpop.f32.mrb[68].mxu1  ;;  %v754_v26 = vadd.f32 %v4338_v63, %v4269_v59 }
 0x1a4   : > { %v1418_v38 = vpop.f32.mrb[69].mxu1 }
 0x1a5   : > { %3357 = vpow2.f32 %v2664_v3  ;;  %v1409_v41 = vadd.f32 %v3222_v31, %v1408_v24 }
 0x1a6   : > { %v1188_v44 = vpop.f32.mrb[6].mxu0 }
 0x1a7   : > { %v2665_v46 = vmul.f32 -1.442695, %v1409_v41  ;;  %v3224_v49 = vadd.f32 %v1188_v44, %v739_v39  ;;  %v1190_v52 = vpop.f32.mrb[7].mxu0  ;;  %v2974_v54 = vpop.f32.mrb[70].mxu1  ;;  %v759_v44 = vadd.f32 %v4338_v63, %v4279_v2 }
 0x1a8   : > { %v1428_v57 = vpop.f32.mrb[71].mxu1 }
 0x1a9   : > { %3359 = vpow2.f32 %v2665_v46  ;;  %v1414_v60 = vadd.f32 %v3224_v49, %v2968_v22 }
 0x1aa   : > { %v1193_v62 = vpop.f32.mrb[8].mxu0 }
 0x1ab   : > { %v3356_v1 = vpop.eup %3355  ;;  %v2666_v4 = vmul.f32 -1.442695, %v1414_v60  ;;  %v3226_v5 = vadd.f32 %v1193_v62, %v744_v43  ;;  %v1195_v6 = vpop.f32.mrb[9].mxu0 }
 0x1ac   : > { %v4352_v7 = vpop.f32.mrb[72].mxu1  ;;  %v1653_v47 = vadd.f32 1.0, %v3356_v1 }
 0x1ad   : > { %v1438_v9 = vpop.f32.mrb[73].mxu1  ;;  %3361 = vpow2.f32 %v2666_v4  ;;  %v1419_v11 = vadd.f32 %v3226_v5, %v1418_v38  ;;  %v764_v5 = vadd.f32 %v4338_v63, %v4286_v8 }
 0x1ae   : > { %3363 = vrcp.f32 %v1653_v47  ;;  %v1198_v13 = vpop.f32.mrb[10].mxu0 }
 0x1af   : > { %v3358_v14 = vpop.eup %3357  ;;  %v2667_v51 = vmul.f32 -1.442695, %v1419_v11  ;;  %v3228_v16 = vadd.f32 %v1198_v13, %v749_v10  ;;  %v1200_v18 = vpop.f32.mrb[11].mxu0 }
 0x1b0   : > { %v4356_v20 = vpop.f32.mrb[74].mxu1  ;;  %v1654_v22 = vadd.f32 1.0, %v3358_v14  ;;  %v769_v18 = vadd.f32 %v4338_v63, %v4290_v12 }
 0x1b1   : > { %v4358_v24 = vpop.f32.mrb[75].mxu1  ;;  %3365 = vpow2.f32 %v2667_v51  ;;  %v1424_v35 = vadd.f32 %v3228_v16, %v2971_v36 }
 0x1b2   : > { %3367 = vrcp.f32 %v1654_v22  ;;  %v1203_v55 = vpop.f32.mrb[12].mxu0 }
 0x1b3   : > { %v3360_v28 = vpop.eup %3359  ;;  %v2668_v3 = vmul.f32 -1.442695, %v1424_v35  ;;  %v3230_v31 = vadd.f32 %v1203_v55, %v754_v26  ;;  %v1205_v33 = vpop.f32.mrb[13].mxu0 }
 0x1b4   : > { %v4362_v38 = vpop.f32.mrb[76].mxu1  ;;  %v1655_v39 = vadd.f32 1.0, %v3360_v28 }
 0x1b5   : > { %v4364_v41 = vpop.f32.mrb[77].mxu1  ;;  %3369 = vpow2.f32 %v2668_v3  ;;  %v1429_v46 = vadd.f32 %v3230_v31, %v1428_v57 }
 0x1b6   : > { %3371 = vrcp.f32 %v1655_v39  ;;  %v1208_v59 = vpop.f32.mrb[14].mxu0  ;;  %v774_v39 = vadd.f32 %v4338_v63, %v4293_v15  ;;  %v779_v15 = vadd.f32 %v4338_v63, %v4295_v17  ;;  %v784_v17 = vadd.f32 %v4338_v63, %v4297_v19 }
 0x1b7   : > { %v3362_v36 = vpop.eup %3361  ;;  %v2669_v49 = vmul.f32 -1.442695, %v1429_v46  ;;  %v3232_v52 = vadd.f32 %v1208_v59, %v759_v44  ;;  %v1210_v43 = vpop.f32.mrb[15].mxu0  ;;  %v789_v19 = vadd.f32 %v4338_v63, %v4299_v21  ;;  %v794_v21 = vadd.f32 %v4338_v63, %v4301_v23 }
 0x1b8   : > { %v4368_v60 = vpop.f32.mrb[78].mxu1  ;;  %v3364_v62 = vpop.eup %3363  ;;  %v1656_v1 = vadd.f32 1.0, %v3362_v36  ;;  %v799_v23 = vadd.f32 %v4338_v63, %v4303_v25  ;;  %v804_v25 = vadd.f32 %v4338_v63, %v4305_v27 }
 0x1b9   : > { %v4370_v4 = vpop.f32.mrb[79].mxu1  ;;  %3373 = vpow2.f32 %v2669_v49  ;;  %v1434_v2 = vadd.f32 %v3232_v52, %v2974_v54  ;;  %3017 = vmatprep.mubr.msk.f32.mxu1 %vm1759_vm2, %v3364_v62 }
 0x1ba   : > { %3375 = vrcp.f32 %v1656_v1  ;;  %v1213_v57 = vpop.f32.mrb[16].mxu0 }
 0x1bb   : > { %v3366_v6 = vpop.eup %3365  ;;  %v2670_v47 = vmul.f32 -1.442695, %v1434_v2  ;;  %v3234_v10 = vadd.f32 %v1213_v57, %v764_v5  ;;  %v1215_v11 = vpop.f32.mrb[17].mxu0 }
 0x1bc   : > { %v4375_v13 = vpop.f32.mrb[80].mxu1  ;;  %v3368_v14 = vpop.eup %3367  ;;  %v1657_v51 = vadd.f32 1.0, %v3366_v6 }
 0x1bd   : > { %v4377_v16 = vpop.f32.mrb[81].mxu1  ;;  %3377 = vpow2.f32 %v2670_v47  ;;  %v1439_v8 = vadd.f32 %v3234_v10, %v1438_v9  ;;  %3018 = vmatmul.mubr.msk.f32.vlgmr.msra.gmra.mrb[96].mxu1 %vm1759_vm2, %v3368_v14 }
 0x1be   : > { %3379 = vrcp.f32 %v1657_v51  ;;  %v1218_v54 = vpop.f32.mrb[18].mxu0 }
 0x1bf   : > { %v3370_v22 = vpop.eup %3369  ;;  %v2671_v26 = vmul.f32 -1.442695, %v1439_v8  ;;  %v3236_v35 = vadd.f32 %v1218_v54, %v769_v18  ;;  %v1220_v55 = vpop.f32.mrb[19].mxu0 }
 0x1c0   : > { %v4382_v28 = vpop.f32.mrb[82].mxu1  ;;  %v3372_v3 = vpop.eup %3371  ;;  %v1658_v31 = vadd.f32 1.0, %v3370_v22 }
 0x1c1   : > { %v4384_v33 = vpop.f32.mrb[83].mxu1  ;;  %3381 = vpow2.f32 %v2671_v26  ;;  %v1444_v12 = vadd.f32 %v3236_v35, %v4352_v7  ;;  %3020 = vmatprep.mubr.msk.f32.mxu1 %vm1759_vm2, %v3372_v3 }
 0x1c2   : > { %3383 = vrcp.f32 %v1658_v31  ;;  %v1223_v9 = vpop.f32.mrb[20].mxu0 }
 0x1c3   : > { %v3374_v44 = vpop.eup %3373  ;;  %v2672_v46 = vmul.f32 -1.442695, %v1444_v12  ;;  %v3238_v59 = vadd.f32 %v1223_v9, %v774_v39  ;;  %v1225_v36 = vpop.f32.mrb[21].mxu0 }
 0x1c4   : > { %v4390_v49 = vpop.f32.mrb[84].mxu1  ;;  %v3376_v52 = vpop.eup %3375  ;;  %v1659_v43 = vadd.f32 1.0, %v3374_v44 }
 0x1c5   : > { %v4392_v62 = vpop.f32.mrb[85].mxu1  ;;  %3385 = vpow2.f32 %v2672_v46  ;;  %v1449_v7 = vadd.f32 %v3238_v59, %v4358_v24  ;;  %3021 = vmatmul.mubr.msk.f32.gmra.mrb[98].mxu1 %vm1759_vm2, %v3376_v52 }
 0x1c6   : > { %3387 = vrcp.f32 %v1659_v43  ;;  %v1228_v1 = vpop.f32.mrb[22].mxu0 }
 0x1c7   : > { %v3378_v5 = vpop.eup %3377  ;;  %v2673_v2 = vmul.f32 -1.442695, %v1449_v7  ;;  %v3240_v57 = vadd.f32 %v1228_v1, %v779_v15  ;;  %v1230_v6 = vpop.f32.mrb[23].mxu0 }
 0x1c8   : > { %v4398_v47 = vpop.f32.mrb[86].mxu1  ;;  %v3380_v10 = vpop.eup %3379  ;;  %v1660_v11 = vadd.f32 1.0, %v3378_v5 }
 0x1c9   : > { %v4400_v14 = vpop.f32.mrb[87].mxu1  ;;  %3389 = vpow2.f32 %v2673_v2  ;;  %v1454_v24 = vadd.f32 %v3240_v57, %v4356_v20  ;;  %3023 = vmatprep.mubr.msk.f32.mxu1 %vm1759_vm2, %v3380_v10 }
 0x1ca   : > { %3391 = vrcp.f32 %v1660_v11  ;;  %v1233_v51 = vpop.f32.mrb[24].mxu0 }
 0x1cb   : > { %v3382_v18 = vpop.eup %3381  ;;  %v2674_v8 = vmul.f32 -1.442695, %v1454_v24  ;;  %v3242_v54 = vadd.f32 %v1233_v51, %v784_v17  ;;  %v1235_v22 = vpop.f32.mrb[25].mxu0 }
 0x1cc   : > { %v4406_v26 = vpop.f32.mrb[88].mxu1  ;;  %v3384_v35 = vpop.eup %3383  ;;  %v1661_v55 = vadd.f32 1.0, %v3382_v18 }
 0x1cd   : > { %v4408_v3 = vpop.f32.mrb[89].mxu1  ;;  %3393 = vpow2.f32 %v2674_v8  ;;  %v1459_v20 = vadd.f32 %v3242_v54, %v4364_v41  ;;  %3024 = vmatmul.mubr.msk.f32.gmra.mrb[100].mxu1 %vm1759_vm2, %v3384_v35 }
 0x1ce   : > { %3395 = vrcp.f32 %v1661_v55  ;;  %v1238_v31 = vpop.f32.mrb[26].mxu0 }
 0x1cf   : > { %v3386_v39 = vpop.eup %3385  ;;  %v2675_v12 = vmul.f32 -1.442695, %v1459_v20  ;;  %v3244_v9 = vadd.f32 %v1238_v31, %v789_v19  ;;  %v1240_v44 = vpop.f32.mrb[27].mxu0 }
 0x1d0   : > { %v4414_v46 = vpop.f32.mrb[90].mxu1  ;;  %v3388_v59 = vpop.eup %3387  ;;  %v1662_v36 = vadd.f32 1.0, %v3386_v39  ;;  %v809_v44 = vadd.f32 %v4338_v63, %v4307_v29 }
 0x1d1   : > { %v4416_v52 = vpop.f32.mrb[91].mxu1  ;;  %3397 = vpow2.f32 %v2675_v12  ;;  %v1464_v41 = vadd.f32 %v3244_v9, %v4362_v38  ;;  %3026 = vmatprep.mubr.msk.f32.mxu1 %vm1759_vm2, %v3388_v59 }
 0x1d2   : > { %3399 = vrcp.f32 %v1662_v36  ;;  %v1243_v43 = vpop.f32.mrb[28].mxu0 }
 0x1d3   : > { %v3390_v15 = vpop.eup %3389  ;;  %v2676_v7 = vmul.f32 -1.442695, %v1464_v41  ;;  %v3246_v1 = vadd.f32 %v1243_v43, %v794_v21  ;;  %v1245_v5 = vpop.f32.mrb[29].mxu0 }
 0x1d4   : > { %v4422_v2 = vpop.f32.mrb[92].mxu1  ;;  %v3392_v57 = vpop.eup %3391  ;;  %v1663_v6 = vadd.f32 1.0, %v3390_v15 }
 0x1d5   : > { %v4424_v10 = vpop.f32.mrb[93].mxu1  ;;  %3401 = vpow2.f32 %v2676_v7  ;;  %v1469_v38 = vadd.f32 %v3246_v1, %v4370_v4  ;;  %3027 = vmatmul.mubr.msk.f32.gmra.mrb[102].mxu1 %vm1759_vm2, %v3392_v57  ;;  %v814_v7 = vadd.f32 %v4338_v63, %v4309_v30 }
 0x1d6   : > { %3403 = vrcp.f32 %v1663_v6  ;;  %v1248_v11 = vpop.f32.mrb[30].mxu0 }
 0x1d7   : > { %v3394_v17 = vpop.eup %3393  ;;  %v2677_v24 = vmul.f32 -1.442695, %v1469_v38  ;;  %v3248_v51 = vadd.f32 %v1248_v11, %v799_v23  ;;  %v1250_v18 = vpop.f32.mrb[31].mxu0  ;;  %v819_v11 = vadd.f32 %v4338_v63, %v4311_v32 }
 0x1d8   : > { %v4430_v8 = vpop.f32.mrb[94].mxu1  ;;  %v3396_v54 = vpop.eup %3395  ;;  %v1664_v22 = vadd.f32 1.0, %v3394_v17 }
 0x1d9   : > { %v4432_v35 = vpop.f32.mrb[95].mxu1  ;;  %3405 = vpow2.f32 %v2677_v24  ;;  %v1474_v4 = vadd.f32 %v3248_v51, %v4368_v60  ;;  %3029 = vmatprep.mubr.msk.f32.mxu1 %vm1759_vm2, %v3396_v54 }
 0x1da   : > { %3407 = vrcp.f32 %v1664_v22  ;;  %v1253_v55 = vpop.f32.mrb[32].mxu0 }
 0x1db   : > { %v3398_v19 = vpop.eup %3397  ;;  %v2678_v20 = vmul.f32 -1.442695, %v1474_v4  ;;  %v3250_v31 = vadd.f32 %v1253_v55, %v804_v25  ;;  %v1255_v39 = vpop.f32.mrb[33].mxu0  ;;  %v824_v25 = vadd.f32 %v4338_v63, %v4313_v34 }
 0x1dc   : > { %v3400_v12 = vpop.eup %3399  ;;  %v1665_v9 = vadd.f32 1.0, %v3398_v19 }
 0x1dd   : > { %3409 = vpow2.f32 %v2678_v20  ;;  %v1479_v59 = vadd.f32 %v3250_v31, %v4377_v16  ;;  %3030 = vmatmul.mubr.msk.f32.gmra.mrb[104].mxu1 %vm1759_vm2, %v3400_v12  ;;  %v829_v12 = vadd.f32 %v4338_v63, %v4315_v37 }
 0x1de   : > { %3411 = vrcp.f32 %v1665_v9  ;;  %v1258_v27 = vpop.f32.mrb[34].mxu0 }
 0x1df   : > { %v3402_v60 = vpop.eup %3401  ;;  %v2679_v36 = vmul.f32 -1.442695, %v1479_v59  ;;  %v3252_v21 = vadd.f32 %v1258_v27, %v809_v44  ;;  %v1260_v41 = vpop.f32.mrb[35].mxu0 }
 0x1e0   : > { %v3404_v43 = vpop.eup %3403  ;;  %v1666_v15 = vadd.f32 1.0, %v3402_v60 }
 0x1e1   : > { %3413 = vpow2.f32 %v2679_v36  ;;  %v1484_v1 = vadd.f32 %v3252_v21, %v4375_v13  ;;  %3032 = vmatprep.mubr.msk.f32.mxu1 %vm1759_vm2, %v3404_v43  ;;  %v834_v21 = vadd.f32 %v4338_v63, %v4317_v40 }
 0x1e2   : > { %3415 = vrcp.f32 %v1666_v15  ;;  %v1263_v29 = vpop.f32.mrb[36].mxu0 }
 0x1e3   : > { %v3406_v16 = vpop.eup %3405  ;;  %v2680_v5 = vmul.f32 -1.442695, %v1484_v1  ;;  %v3254_v57 = vadd.f32 %v1263_v29, %v814_v7  ;;  %v1265_v6 = vpop.f32.mrb[37].mxu0 }
 0x1e4   : > { %v3408_v23 = vpop.eup %3407  ;;  %v1667_v38 = vadd.f32 1.0, %v3406_v16  ;;  %v839_v16 = vadd.f32 %v4338_v63, %v4319_v42 }
 0x1e5   : > { %3417 = vpow2.f32 %v2680_v5  ;;  %v1489_v17 = vadd.f32 %v3254_v57, %v4384_v33  ;;  %3033 = vmatmul.mubr.msk.f32.gmra.mrb[106].mxu1 %vm1759_vm2, %v3408_v23 }
 0x1e6   : > { %3419 = vrcp.f32 %v1667_v38  ;;  %v1268_v30 = vpop.f32.mrb[38].mxu0 }
 0x1e7   : > { %v3410_v13 = vpop.eup %3409  ;;  %v2681_v24 = vmul.f32 -1.442695, %v1489_v17  ;;  %v3256_v51 = vadd.f32 %v1268_v30, %v819_v11  ;;  %v1270_v18 = vpop.f32.mrb[39].mxu0  ;;  %v844_v17 = vadd.f32 %v4338_v63, %v4321_v45 }
 0x1e8   : > { %v3412_v54 = vpop.eup %3411  ;;  %v1668_v22 = vadd.f32 1.0, %v3410_v13 }
 0x1e9   : > { %3421 = vpow2.f32 %v2681_v24  ;;  %v1494_v4 = vadd.f32 %v3256_v51, %v4382_v28  ;;  %3035 = vmatprep.mubr.msk.f32.mxu1 %vm1759_vm2, %v3412_v54 }
 0x1ea   : > { %3423 = vrcp.f32 %v1668_v22  ;;  %v1273_v32 = vpop.f32.mrb[40].mxu0  ;;  %v849_v22 = vadd.f32 %v4338_v63, %v4323_v48 }
 0x1eb   : > { %v3414_v33 = vpop.eup %3413  ;;  %v2682_v55 = vmul.f32 -1.442695, %v1494_v4  ;;  %v3258_v19 = vadd.f32 %v1273_v32, %v824_v25  ;;  %v1275_v20 = vpop.f32.mrb[41].mxu0 }
 0x1ec   : > { %v3416_v31 = vpop.eup %3415  ;;  %v1669_v39 = vadd.f32 1.0, %v3414_v33  ;;  %v854_v20 = vadd.f32 %v4338_v63, %v4325_v50 }
 0x1ed   : > { %3425 = vpow2.f32 %v2682_v55  ;;  %v1499_v9 = vadd.f32 %v3258_v19, %v4392_v62  ;;  %3036 = vmatmul.mubr.msk.f32.gmra.mrb[108].mxu1 %vm1759_vm2, %v3416_v31 }
 0x1ee   : > { %3427 = vrcp.f32 %v1669_v39  ;;  %v1278_v34 = vpop.f32.mrb[42].mxu0 }
 0x1ef   : > { %v3418_v28 = vpop.eup %3417  ;;  %v2683_v44 = vmul.f32 -1.442695, %v1499_v9  ;;  %v3260_v59 = vadd.f32 %v1278_v34, %v829_v12  ;;  %v1280_v27 = vpop.f32.mrb[43].mxu0 }
 0x1f0   : > { %v3420_v60 = vpop.eup %3419  ;;  %v1670_v36 = vadd.f32 1.0, %v3418_v28 }
 0x1f1   : > { %3429 = vpow2.f32 %v2683_v44  ;;  %v1504_v41 = vadd.f32 %v3260_v59, %v4390_v49  ;;  %3038 = vmatprep.mubr.msk.f32.mxu1 %vm1759_vm2, %v3420_v60  ;;  %v859_v44 = vadd.f32 %v4338_v63, %v4327_v53 }
 0x1f2   : > { %3431 = vrcp.f32 %v1670_v36  ;;  %v1283_v37 = vpop.f32.mrb[44].mxu0 }
 0x1f3   : > { %v3422_v62 = vpop.eup %3421  ;;  %v2684_v43 = vmul.f32 -1.442695, %v1504_v41  ;;  %v3262_v15 = vadd.f32 %v1283_v37, %v834_v21  ;;  %v1285_v7 = vpop.f32.mrb[45].mxu0  ;;  %v864_v37 = vadd.f32 %v4338_v63, %v4329_v56 }
 0x1f4   : > { %v3424_v1 = vpop.eup %3423  ;;  %v1671_v29 = vadd.f32 1.0, %v3422_v62 }
 0x1f5   : > { %3433 = vpow2.f32 %v2684_v43  ;;  %v1509_v5 = vadd.f32 %v3262_v15, %v4400_v14  ;;  %3039 = vmatmul.mubr.msk.f32.gmra.mrb[110].mxu1 %vm1759_vm2, %v3424_v1 }
 0x1f6   : > { %3435 = vrcp.f32 %v1671_v29  ;;  %v1288_v40 = vpop.f32.mrb[46].mxu0 }
 0x1f7   : > { %v3426_v49 = vpop.eup %3425  ;;  %v2685_v57 = vmul.f32 -1.442695, %v1509_v5  ;;  %v3264_v6 = vadd.f32 %v1288_v40, %v839_v16  ;;  %v1290_v23 = vpop.f32.mrb[47].mxu0  ;;  %v869_v16 = vadd.f32 %v4338_v63, %v4331_v58 }
 0x1f8   : > { %v3428_v38 = vpop.eup %3427  ;;  %v1672_v11 = vadd.f32 1.0, %v3426_v49 }
 0x1f9   : > { %3437 = vpow2.f32 %v2685_v57  ;;  %v1514_v30 = vadd.f32 %v3264_v6, %v4398_v47  ;;  %3041 = vmatprep.mubr.msk.f32.mxu1 %vm1759_vm2, %v3428_v38  ;;  %v874_v38 = vadd.f32 %v4338_v63, %v4333_v61 }
 0x1fa   : > { %3439 = vrcp.f32 %v1672_v11  ;;  %v1293_v42 = vpop.f32.mrb[48].mxu0 }
 0x1fb   : > { %v3430_v14 = vpop.eup %3429  ;;  %v2686_v13 = vmul.f32 -1.442695, %v1514_v30  ;;  %v3266_v24 = vadd.f32 %v1293_v42, %v844_v17  ;;  %v1295_v51 = vpop.f32.mrb[49].mxu0 }
 0x1fc   : > { %v3432_v18 = vpop.eup %3431  ;;  %v1673_v54 = vadd.f32 1.0, %v3430_v14 }
 0x1fd   : > { %3441 = vpow2.f32 %v2686_v13  ;;  %v1519_v25 = vadd.f32 %v3266_v24, %v4408_v3  ;;  %3042 = vmatmul.mubr.msk.f32.gmra.mrb[112].mxu1 %vm1759_vm2, %v3432_v18  ;;  %v879_v24 = vadd.f32 %v4338_v63, %v4340_v0 }
 0x1fe   : > { %3443 = vrcp.f32 %v1673_v54  ;;  %v1298_v45 = vpop.f32.mrb[50].mxu0 }
 0x1ff   : > { %v3434_v47 = vpop.eup %3433  ;;  %v2687_v4 = vmul.f32 -1.442695, %v1519_v25  ;;  %v3268_v32 = vadd.f32 %v1298_v45, %v849_v22  ;;  %v1300_v33 = vpop.f32.mrb[51].mxu0 }
 0x200   : > { %v3436_v55 = vpop.eup %3435  ;;  %v1674_v19 = vadd.f32 1.0, %v3434_v47 }
 0x201   : > { %3445 = vpow2.f32 %v2687_v4  ;;  %v1524_v31 = vadd.f32 %v3268_v32, %v4406_v26  ;;  %3044 = vmatprep.mubr.msk.f32.mxu1 %vm1759_vm2, %v3436_v55 }
 0x202   : > { %3447 = vrcp.f32 %v1674_v19  ;;  %v1303_v48 = vpop.f32.mrb[52].mxu0 }
 0x203   : > { %v3438_v3 = vpop.eup %3437  ;;  %v2688_v39 = vmul.f32 -1.442695, %v1524_v31  ;;  %v3270_v12 = vadd.f32 %v1303_v48, %v854_v20  ;;  %v1305_v9 = vpop.f32.mrb[53].mxu0 }
 0x204   : > { %v3440_v34 = vpop.eup %3439  ;;  %v1675_v28 = vadd.f32 1.0, %v3438_v3 }
 0x205   : > { %3449 = vpow2.f32 %v2688_v39  ;;  %v1529_v59 = vadd.f32 %v3270_v12, %v4416_v52  ;;  %3045 = vmatmul.mubr.msk.f32.gmra.mrb[114].mxu1 %vm1759_vm2, %v3440_v34  ;;  %v4510_v34 = vld [vmem:[%s4829_s4] ss:$0 sm:$0xff] }
 0x206   : > { %3451 = vrcp.f32 %v1675_v28  ;;  %v1308_v50 = vpop.f32.mrb[54].mxu0 }
 0x207   : > { %v3442_v26 = vpop.eup %3441  ;;  %v2689_v27 = vmul.f32 -1.442695, %v1529_v59  ;;  %v3272_v60 = vadd.f32 %v1308_v50, %v859_v44  ;;  %v1310_v36 = vpop.f32.mrb[55].mxu0 }
 0x208   : > { %v3444_v21 = vpop.eup %3443  ;;  %v1676_v41 = vadd.f32 1.0, %v3442_v26 }
 0x209   : > { %3453 = vpow2.f32 %v2689_v27  ;;  %v1534_v62 = vadd.f32 %v3272_v60, %v4414_v46  ;;  %3047 = vmatprep.mubr.msk.f32.mxu1 %vm1759_vm2, %v3444_v21 }
 0x20a   : > { %3455 = vrcp.f32 %v1676_v41  ;;  %v1313_v53 = vpop.f32.mrb[56].mxu0 }
 0x20b   : > { %v3446_v52 = vpop.eup %3445  ;;  %v2690_v43 = vmul.f32 -1.442695, %v1534_v62  ;;  %v3274_v15 = vadd.f32 %v1313_v53, %v864_v37  ;;  %v1315_v7 = vpop.f32.mrb[57].mxu0 }
 0x20c   : > { %v3448_v1 = vpop.eup %3447  ;;  %v1677_v29 = vadd.f32 1.0, %v3446_v52 }
 0x20d   : > { %3457 = vpow2.f32 %v2690_v43  ;;  %v1539_v5 = vadd.f32 %v3274_v15, %v4424_v10  ;;  %3048 = vmatmul.mubr.msk.f32.gmra.mrb[116].mxu1 %vm1759_vm2, %v3448_v1 }
 0x20e   : > { %3459 = vrcp.f32 %v1677_v29  ;;  %v1318_v56 = vpop.f32.mrb[58].mxu0 }
 0x20f   : > { %v3450_v46 = vpop.eup %3449  ;;  %v2691_v40 = vmul.f32 -1.442695, %v1539_v5  ;;  %v3276_v49 = vadd.f32 %v1318_v56, %v869_v16  ;;  %v1320_v57 = vpop.f32.mrb[59].mxu0 }
 0x210   : > { %v3452_v6 = vpop.eup %3451  ;;  %v1678_v23 = vadd.f32 1.0, %v3450_v46 }
 0x211   : > { %3461 = vpow2.f32 %v2691_v40  ;;  %v1544_v11 = vadd.f32 %v3276_v49, %v4422_v2  ;;  %3050 = vmatprep.mubr.msk.f32.mxu1 %vm1759_vm2, %v3452_v6 }
 0x212   : > { %3463 = vrcp.f32 %v1678_v23  ;;  %v1323_v58 = vpop.f32.mrb[60].mxu0 }
 0x213   : > { %v3454_v10 = vpop.eup %3453  ;;  %v2692_v17 = vmul.f32 -1.442695, %v1544_v11  ;;  %v3278_v30 = vadd.f32 %v1323_v58, %v874_v38  ;;  %v1325_v42 = vpop.f32.mrb[61].mxu0 }
 0x214   : > { %v3456_v14 = vpop.eup %3455  ;;  %v1679_v13 = vadd.f32 1.0, %v3454_v10 }
 0x215   : > { %3465 = vpow2.f32 %v2692_v17  ;;  %v1549_v51 = vadd.f32 %v3278_v30, %v4432_v35  ;;  %3051 = vmatmul.mubr.msk.f32.gmra.mrb[118].mxu1 %vm1759_vm2, %v3456_v14 }
 0x216   : > { %3467 = vrcp.f32 %v1679_v13  ;;  %v1328_v61 = vpop.f32.mrb[62].mxu0 }
 0x217   : > { %v3458_v2 = vpop.eup %3457  ;;  %v2693_v18 = vmul.f32 -1.442695, %v1549_v51  ;;  %v3280_v54 = vadd.f32 %v1328_v61, %v879_v24  ;;  %v1330_v22 = vpop.f32.mrb[63].mxu0 }
 0x218   : > { %v3460_v25 = vpop.eup %3459  ;;  %v1680_v45 = vadd.f32 1.0, %v3458_v2 }
 0x219   : > { %3469 = vpow2.f32 %v2693_v18  ;;  %v1554_v47 = vadd.f32 %v3280_v54, %v4430_v8  ;;  %3053 = vmatprep.mubr.msk.f32.mxu1 %vm1759_vm2, %v3460_v25 }
 0x21a   : > { %3471 = vrcp.f32 %v1680_v45 }
 0x21b   : > { %v3462_v63 = vpop.eup %3461  ;;  %v2694_v0 = vmul.f32 -1.442695, %v1554_v47 }
 0x21c   : > { %v3464_v4 = vpop.eup %3463  ;;  %v1681_v35 = vadd.f32 1.0, %v3462_v63 }
 0x21d   : > { %3473 = vpow2.f32 %v2694_v0  ;;  %3054 = vmatmul.mubr.msk.f32.gmra.mrb[120].mxu1 %vm1759_vm2, %v3464_v4 }
 0x21e   : > { %3475 = vrcp.f32 %v1681_v35 }
 0x21f   : > { %v3466_v32 = vpop.eup %3465 }
 0x220   : > { %v3468_v33 = vpop.eup %3467  ;;  %v1682_v55 = vadd.f32 1.0, %v3466_v32 }
 0x221   : > { %3056 = vmatprep.mubr.msk.f32.mxu1 %vm1759_vm2, %v3468_v33 }
 0x222   : > { %3477 = vrcp.f32 %v1682_v55 }
 0x223   : > { %v3470_v19 = vpop.eup %3469 }
 0x224   : > { %v3472_v20 = vpop.eup %3471  ;;  %v1683_v8 = vadd.f32 1.0, %v3470_v19 }
 0x225   : > { %3057 = vmatmul.mubr.msk.f32.gmra.mrb[122].mxu1 %vm1759_vm2, %v3472_v20 }
 0x226   : > { %3479 = vrcp.f32 %v1683_v8 }
 0x227   : > { %v3474_v31 = vpop.eup %3473 }
 0x228   : > { %v3476_v48 = vpop.eup %3475  ;;  %v1684_v3 = vadd.f32 1.0, %v3474_v31 }
 0x229   : > { %3059 = vmatprep.mubr.msk.f32.mxu1 %vm1759_vm2, %v3476_v48 }
 0x22a   : > { %3481 = vrcp.f32 %v1684_v3 }
 0x22c   : > { %v3478_v39 = vpop.eup %3477 }
 0x22d   : > { %3060 = vmatmul.mubr.msk.f32.gmra.mrb[124].mxu1 %vm1759_vm2, %v3478_v39 }
 0x230   : > { %v3480_v12 = vpop.eup %3479 }
 0x231   : > { %3062 = vmatprep.mubr.msk.f32.mxu1 %vm1759_vm2, %v3480_v12 }
 0x234   : > { %v3482_v9 = vpop.eup %3481 }
 0x235   : > { %3063 = vmatmul.mubr.msk.f32.gmra.mrb[126].mxu1 %vm1759_vm2, %v3482_v9 }
 0x290   : > { %v3019_v28 = vpop.f32.mrb[96].mxu1 }
 0x291   : > { %v4513_v44 = vadd.f32 %v3019_v28, %v4510_v34  ;;  %v1926_v59 = vpop.f32.mrb[97].mxu1 }
 0x292   : > { %v4517_v50 = vadd.f32 %v4510_v34, %v1926_v59 }
 0x293   : > { %2087 = vmax.xlane.f32.xlu0 %v4513_v44 }
 0x297   : > { %2085 = vmax.xlane.f32.xlu0 %v4517_v50 }
 0x298   : > { %v3022_v26 = vpop.f32.mrb[98].mxu1 }
 0x299   : > { %v4521_v27 = vadd.f32 %v3022_v26, %v4510_v34  ;;  %v1936_v60 = vpop.f32.mrb[99].mxu1 }
 0x29a   : > { %v4525_v36 = vadd.f32 %v4510_v34, %v1936_v60 }
 0x29b   : > { %2091 = vmax.xlane.f32.xlu1 %v4521_v27 }
 0x29f   : > { %2089 = vmax.xlane.f32.xlu1 %v4525_v36 }
 0x2a0   : > { %v3025_v21 = vpop.f32.mrb[100].mxu1 }
 0x2a1   : > { %v4529_v41 = vadd.f32 %v3025_v21, %v4510_v34  ;;  %v1946_v37 = vpop.f32.mrb[101].mxu1 }
 0x2a2   : > { %v4532_v62 = vadd.f32 %v4510_v34, %v1946_v37 }
 0x2a3   : > { %2095 = vmax.xlane.f32.xlu1 %v4529_v41 }
 0x2a4   : > { %2093 = vmax.xlane.f32.xlu0 %v4532_v62 }
 0x2a8   : > { %v3028_v53 = vpop.f32.mrb[102].mxu1 }
 0x2a9   : > { %v4537_v52 = vadd.f32 %v3028_v53, %v4510_v34  ;;  %v1956_v43 = vpop.f32.mrb[103].mxu1 }
 0x2aa   : > { %v4540_v15 = vadd.f32 %v4510_v34, %v1956_v43 }
 0x2ab   : > { %2099 = vmax.xlane.f32.xlu1 %v4537_v52 }
 0x2ac   : > { %2097 = vmax.xlane.f32.xlu0 %v4540_v15 }
 0x2b0   : > { %v3031_v7 = vpop.f32.mrb[104].mxu1 }
 0x2b1   : > { %v4545_v1 = vadd.f32 %v3031_v7, %v4510_v34  ;;  %v1966_v29 = vpop.f32.mrb[105].mxu1 }
 0x2b2   : > { %v4548_v16 = vadd.f32 %v4510_v34, %v1966_v29 }
 0x2b3   : > { %2103 = vmax.xlane.f32.xlu1 %v4545_v1 }
 0x2b4   : > { %2101 = vmax.xlane.f32.xlu0 %v4548_v16 }
 0x2b8   : > { %v3034_v5 = vpop.f32.mrb[106].mxu1 }
 0x2b9   : > { %v4553_v56 = vadd.f32 %v3034_v5, %v4510_v34  ;;  %v1976_v46 = vpop.f32.mrb[107].mxu1 }
 0x2ba   : > { %v4556_v40 = vadd.f32 %v4510_v34, %v1976_v46 }
 0x2bb   : > { %2107 = vmax.xlane.f32.xlu1 %v4553_v56 }
 0x2bc   : > { %2105 = vmax.xlane.f32.xlu0 %v4556_v40 }
 0x2c0   : > { %v3037_v49 = vpop.f32.mrb[108].mxu1 }
 0x2c1   : > { %v4561_v57 = vadd.f32 %v3037_v49, %v4510_v34  ;;  %v1986_v6 = vpop.f32.mrb[109].mxu1 }
 0x2c2   : > { %v4564_v23 = vadd.f32 %v4510_v34, %v1986_v6 }
 0x2c3   : > { %2111 = vmax.xlane.f32.xlu1 %v4561_v57 }
 0x2c4   : > { %2109 = vmax.xlane.f32.xlu0 %v4564_v23 }
 0x2c8   : > { %v3040_v38 = vpop.f32.mrb[110].mxu1 }
 0x2c9   : > { %v4569_v11 = vadd.f32 %v3040_v38, %v4510_v34  ;;  %v1996_v58 = vpop.f32.mrb[111].mxu1 }
 0x2ca   : > { %v4572_v10 = vadd.f32 %v4510_v34, %v1996_v58 }
 0x2cb   : > { %2115 = vmax.xlane.f32.xlu1 %v4569_v11 }
 0x2cc   : > { %2113 = vmax.xlane.f32.xlu0 %v4572_v10 }
 0x2d0   : > { %v3043_v17 = vpop.f32.mrb[112].mxu1 }
 0x2d1   : > { %v4577_v30 = vadd.f32 %v3043_v17, %v4510_v34  ;;  %v2006_v42 = vpop.f32.mrb[113].mxu1 }
 0x2d2   : > { %v4580_v14 = vadd.f32 %v4510_v34, %v2006_v42 }
 0x2d3   : > { %2119 = vmax.xlane.f32.xlu1 %v4577_v30 }
 0x2d4   : > { %2117 = vmax.xlane.f32.xlu0 %v4580_v14 }
 0x2d8   : > { %v3046_v13 = vpop.f32.mrb[114].mxu1 }
 0x2d9   : > { %v4585_v24 = vadd.f32 %v3046_v13, %v4510_v34  ;;  %v2016_v51 = vpop.f32.mrb[115].mxu1 }
 0x2da   : > { %v4588_v61 = vadd.f32 %v4510_v34, %v2016_v51 }
 0x2db   : > { %2123 = vmax.xlane.f32.xlu1 %v4585_v24 }
 0x2dc   : > { %2121 = vmax.xlane.f32.xlu0 %v4588_v61 }
 0x2e0   : > { %v3049_v2 = vpop.f32.mrb[116].mxu1 }
 0x2e1   : > { %v4593_v18 = vadd.f32 %v3049_v2, %v4510_v34  ;;  %v2026_v54 = vpop.f32.mrb[117].mxu1 }
 0x2e2   : > { %v4596_v22 = vadd.f32 %v4510_v34, %v2026_v54 }
 0x2e3   : > { %2127 = vmax.xlane.f32.xlu1 %v4593_v18 }
 0x2e4   : > { %2125 = vmax.xlane.f32.xlu0 %v4596_v22 }
 0x2e8   : > { %v3052_v25 = vpop.f32.mrb[118].mxu1 }
 0x2e9   : > { %v4601_v45 = vadd.f32 %v3052_v25, %v4510_v34  ;;  %v2036_v47 = vpop.f32.mrb[119].mxu1 }
 0x2ea   : > { %v4604_v63 = vadd.f32 %v4510_v34, %v2036_v47 }
 0x2eb   : > { %2131 = vmax.xlane.f32.xlu1 %v4601_v45 }
 0x2ec   : > { %2129 = vmax.xlane.f32.xlu0 %v4604_v63 }
 0x2f0   : > { %v3055_v0 = vpop.f32.mrb[120].mxu1 }
 0x2f1   : > { %v4609_v4 = vadd.f32 %v3055_v0, %v4510_v34  ;;  %v2046_v35 = vpop.f32.mrb[121].mxu1 }
 0x2f2   : > { %v4612_v32 = vadd.f32 %v4510_v34, %v2046_v35 }
 0x2f3   : > { %2135 = vmax.xlane.f32.xlu1 %v4609_v4 }
 0x2f4   : > { %2133 = vmax.xlane.f32.xlu0 %v4612_v32 }
 0x2f8   : > { %v3058_v33 = vpop.f32.mrb[122].mxu1 }
 0x2f9   : > { %v4617_v55 = vadd.f32 %v3058_v33, %v4510_v34  ;;  %v2056_v19 = vpop.f32.mrb[123].mxu1 }
 0x2fa   : > { %v4620_v20 = vadd.f32 %v4510_v34, %v2056_v19 }
 0x2fb   : > { %2139 = vmax.xlane.f32.xlu1 %v4617_v55 }
 0x2fc   : > { %2137 = vmax.xlane.f32.xlu0 %v4620_v20 }
 0x300   : > { %v3061_v8 = vpop.f32.mrb[124].mxu1 }
 0x301   : > { %v4625_v31 = vadd.f32 %v3061_v8, %v4510_v34  ;;  %v2066_v48 = vpop.f32.mrb[125].mxu1 }
 0x302   : > { %v4628_v3 = vadd.f32 %v4510_v34, %v2066_v48 }
 0x303   : > { %2143 = vmax.xlane.f32.xlu1 %v4625_v31 }
 0x304   : > { %2141 = vmax.xlane.f32.xlu0 %v4628_v3 }
 0x308   : > { %v3064_v39 = vpop.f32.mrb[126].mxu1 }
 0x309   : > { %v4633_v12 = vadd.f32 %v3064_v39, %v4510_v34  ;;  %v2076_v9 = vpop.f32.mrb[127].mxu1 }
 0x30a   : > { %v4636_v28 = vadd.f32 %v4510_v34, %v2076_v9 }
 0x30b   : > { %2147 = vmax.xlane.f32.xlu1 %v4633_v12 }
 0x30c   : > { %2145 = vmax.xlane.f32.xlu0 %v4636_v28 }
 0x320   : > { %v2088_v59 = vpop.xlane.xlu0 %2087 }
 0x321   : > { %v4641_v26 = vsub.f32 %v4513_v44, %v2088_v59 }
 0x323   : > { %v2183_v60 = vmul.f32 1.442695, %v4641_v26 }
 0x324   : > { %v2086_v21 = vpop.xlane.xlu0 %2085 }
 0x325   : > { %3483 = vpow2.f32 %v2183_v60  ;;  %v4645_v37 = vsub.f32 %v4517_v50, %v2086_v21 }
 0x327   : > { %v2181_v53 = vmul.f32 1.442695, %v4645_v37 }
 0x328   : > { %v2092_v43 = vpop.xlane.xlu1 %2091 }
 0x329   : > { %3485 = vpow2.f32 %v2181_v53  ;;  %v4649_v34 = vsub.f32 %v4521_v27, %v2092_v43 }
 0x32b   : > { %v2187_v7 = vmul.f32 1.442695, %v4649_v34 }
 0x32c   : > { %v2090_v29 = vpop.xlane.xlu1 %2089 }
 0x32d   : > { %3487 = vpow2.f32 %v2187_v7  ;;  %v4653_v44 = vsub.f32 %v4525_v36, %v2090_v29 }
 0x32f   : > { %v3484_v5 = vpop.eup %3483  ;;  %v2185_v46 = vmul.f32 1.442695, %v4653_v44 }
 0x330   : > { %2247 = vadd.xlane.f32.xlu1 %v3484_v5  ;;  %v2096_v50 = vpop.xlane.xlu1 %2095 }
 0x331   : > { %3489 = vpow2.f32 %v2185_v46  ;;  %v4657_v49 = vsub.f32 %v4529_v41, %v2096_v50  ;;  %v2094_v6 = vpop.xlane.xlu0 %2093 }
 0x332   : > { %v4660_v27 = vsub.f32 %v4532_v62, %v2094_v6 }
 0x333   : > { %v3486_v38 = vpop.eup %3485  ;;  %v2191_v58 = vmul.f32 1.442695, %v4657_v49 }
 0x334   : > { %v2189_v17 = vmul.f32 1.442695, %v4660_v27  ;;  %2245 = vadd.xlane.f32.xlu0 %v3486_v38 }
 0x335   : > { %3491 = vpow2.f32 %v2191_v58 }
 0x336   : > { %3493 = vpow2.f32 %v2189_v17 }
 0x337   : > { %v3488_v36 = vpop.eup %3487 }
 0x338   : > { %2251 = vadd.xlane.f32.xlu1 %v3488_v36  ;;  %v2100_v42 = vpop.xlane.xlu1 %2099 }
 0x339   : > { %v4665_v13 = vsub.f32 %v4537_v52, %v2100_v42  ;;  %v2098_v41 = vpop.xlane.xlu0 %2097 }
 0x33a   : > { %v4668_v51 = vsub.f32 %v4540_v15, %v2098_v41 }
 0x33b   : > { %v3490_v62 = vpop.eup %3489  ;;  %v2195_v2 = vmul.f32 1.442695, %v4665_v13 }
 0x33c   : > { %v2193_v54 = vmul.f32 1.442695, %v4668_v51  ;;  %2249 = vadd.xlane.f32.xlu0 %v3490_v62 }
 0x33d   : > { %3495 = vpow2.f32 %v2195_v2 }
 0x33e   : > { %3497 = vpow2.f32 %v2193_v54 }
 0x33f   : > { %v3492_v25 = vpop.eup %3491 }
 0x340   : > { %v3494_v47 = vpop.eup %3493  ;;  %2255 = vadd.xlane.f32.xlu1 %v3492_v25  ;;  %v2104_v0 = vpop.xlane.xlu1 %2103 }
 0x341   : > { %v4673_v35 = vsub.f32 %v4545_v1, %v2104_v0  ;;  %2253 = vadd.xlane.f32.xlu0 %v3494_v47  ;;  %v2102_v52 = vpop.xlane.xlu0 %2101 }
 0x342   : > { %v4676_v15 = vsub.f32 %v4548_v16, %v2102_v52 }
 0x343   : > { %v2199_v33 = vmul.f32 1.442695, %v4673_v35 }
 0x344   : > { %v2197_v19 = vmul.f32 1.442695, %v4676_v15 }
 0x345   : > { %3499 = vpow2.f32 %v2199_v33 }
 0x346   : > { %3501 = vpow2.f32 %v2197_v19 }
 0x347   : > { %v3496_v8 = vpop.eup %3495 }
 0x348   : > { %v3498_v48 = vpop.eup %3497  ;;  %2259 = vadd.xlane.f32.xlu1 %v3496_v8  ;;  %v2108_v39 = vpop.xlane.xlu1 %2107 }
 0x349   : > { %v4681_v9 = vsub.f32 %v4553_v56, %v2108_v39  ;;  %2257 = vadd.xlane.f32.xlu0 %v3498_v48  ;;  %v2106_v1 = vpop.xlane.xlu0 %2105 }
 0x34a   : > { %v4684_v59 = vsub.f32 %v4556_v40, %v2106_v1 }
 0x34b   : > { %v2203_v16 = vmul.f32 1.442695, %v4681_v9 }
 0x34c   : > { %v2201_v60 = vmul.f32 1.442695, %v4684_v59 }
 0x34d   : > { %3503 = vpow2.f32 %v2203_v16 }
 0x34e   : > { %3505 = vpow2.f32 %v2201_v60 }
 0x34f   : > { %v3500_v21 = vpop.eup %3499 }
 0x350   : > { %v3502_v53 = vpop.eup %3501  ;;  %2263 = vadd.xlane.f32.xlu1 %v3500_v21  ;;  %v2112_v43 = vpop.xlane.xlu1 %2111 }
 0x351   : > { %v4689_v7 = vsub.f32 %v4561_v57, %v2112_v43  ;;  %2261 = vadd.xlane.f32.xlu0 %v3502_v53  ;;  %v2110_v56 = vpop.xlane.xlu0 %2109 }
 0x352   : > { %v4692_v29 = vsub.f32 %v4564_v23, %v2110_v56 }
 0x353   : > { %v2207_v40 = vmul.f32 1.442695, %v4689_v7 }
 0x354   : > { %v2205_v5 = vmul.f32 1.442695, %v4692_v29 }
 0x355   : > { %3507 = vpow2.f32 %v2207_v40 }
 0x356   : > { %3509 = vpow2.f32 %v2205_v5 }
 0x357   : > { %v3504_v46 = vpop.eup %3503 }
 0x358   : > { %v3506_v50 = vpop.eup %3505  ;;  %2267 = vadd.xlane.f32.xlu1 %v3504_v46  ;;  %v2116_v6 = vpop.xlane.xlu1 %2115 }
 0x359   : > { %v4697_v38 = vsub.f32 %v4569_v11, %v2116_v6  ;;  %2265 = vadd.xlane.f32.xlu0 %v3506_v50  ;;  %v2114_v57 = vpop.xlane.xlu0 %2113 }
 0x35a   : > { %v4700_v58 = vsub.f32 %v4572_v10, %v2114_v57 }
 0x35b   : > { %v2211_v23 = vmul.f32 1.442695, %v4697_v38 }
 0x35c   : > { %v2209_v17 = vmul.f32 1.442695, %v4700_v58 }
 0x35d   : > { %3511 = vpow2.f32 %v2211_v23 }
 0x35e   : > { %3513 = vpow2.f32 %v2209_v17 }
 0x35f   : > { %v3508_v36 = vpop.eup %3507 }
 0x360   : > { %v3510_v42 = vpop.eup %3509  ;;  %2271 = vadd.xlane.f32.xlu1 %v3508_v36  ;;  %v2120_v41 = vpop.xlane.xlu1 %2119 }
 0x361   : > { %v4705_v62 = vsub.f32 %v4577_v30, %v2120_v41  ;;  %2269 = vadd.xlane.f32.xlu0 %v3510_v42  ;;  %v2118_v11 = vpop.xlane.xlu0 %2117 }
 0x362   : > { %v4708_v2 = vsub.f32 %v4580_v14, %v2118_v11 }
 0x363   : > { %v2215_v10 = vmul.f32 1.442695, %v4705_v62 }
 0x364   : > { %v2213_v54 = vmul.f32 1.442695, %v4708_v2 }
 0x365   : > { %3515 = vpow2.f32 %v2215_v10 }
 0x366   : > { %3517 = vpow2.f32 %v2213_v54 }
 0x367   : > { %v3512_v25 = vpop.eup %3511 }
 0x368   : > { %v3514_v47 = vpop.eup %3513  ;;  %2275 = vadd.xlane.f32.xlu1 %v3512_v25  ;;  %v2124_v0 = vpop.xlane.xlu1 %2123 }
 0x369   : > { %v4713_v52 = vsub.f32 %v4585_v24, %v2124_v0  ;;  %2273 = vadd.xlane.f32.xlu0 %v3514_v47  ;;  %v2122_v30 = vpop.xlane.xlu0 %2121 }
 0x36a   : > { %v4716_v33 = vsub.f32 %v4588_v61, %v2122_v30 }
 0x36b   : > { %v2219_v14 = vmul.f32 1.442695, %v4713_v52 }
 0x36c   : > { %v2217_v19 = vmul.f32 1.442695, %v4716_v33 }
 0x36d   : > { %3519 = vpow2.f32 %v2219_v14 }
 0x36e   : > { %3521 = vpow2.f32 %v2217_v19 }
 0x36f   : > { %v3516_v8 = vpop.eup %3515 }
 0x370   : > { %v3518_v48 = vpop.eup %3517  ;;  %2279 = vadd.xlane.f32.xlu1 %v3516_v8  ;;  %v2128_v39 = vpop.xlane.xlu1 %2127 }
 0x371   : > { %v4721_v1 = vsub.f32 %v4593_v18, %v2128_v39  ;;  %2277 = vadd.xlane.f32.xlu0 %v3518_v48  ;;  %v2126_v24 = vpop.xlane.xlu0 %2125 }
 0x372   : > { %v4724_v16 = vsub.f32 %v4596_v22, %v2126_v24 }
 0x373   : > { %v2223_v61 = vmul.f32 1.442695, %v4721_v1 }
 0x374   : > { %v2221_v60 = vmul.f32 1.442695, %v4724_v16 }
 0x375   : > { %3523 = vpow2.f32 %v2223_v61 }
 0x376   : > { %3525 = vpow2.f32 %v2221_v60 }
 0x377   : > { %v3520_v21 = vpop.eup %3519 }
 0x378   : > { %v3522_v53 = vpop.eup %3521  ;;  %2283 = vadd.xlane.f32.xlu1 %v3520_v21  ;;  %v2132_v43 = vpop.xlane.xlu1 %2131 }
 0x379   : > { %v4729_v56 = vsub.f32 %v4601_v45, %v2132_v43  ;;  %2281 = vadd.xlane.f32.xlu0 %v3522_v53  ;;  %v2130_v18 = vpop.xlane.xlu0 %2129 }
 0x37a   : > { %v4732_v40 = vsub.f32 %v4604_v63, %v2130_v18 }
 0x37b   : > { %v2227_v22 = vmul.f32 1.442695, %v4729_v56 }
 0x37c   : > { %v2225_v5 = vmul.f32 1.442695, %v4732_v40 }
 0x37d   : > { %3527 = vpow2.f32 %v2227_v22 }
 0x37e   : > { %3529 = vpow2.f32 %v2225_v5 }
 0x37f   : > { %v3524_v46 = vpop.eup %3523 }
 0x380   : > { %v3526_v50 = vpop.eup %3525  ;;  %2287 = vadd.xlane.f32.xlu1 %v3524_v46  ;;  %v2136_v6 = vpop.xlane.xlu1 %2135 }
 0x381   : > { %v4737_v57 = vsub.f32 %v4609_v4, %v2136_v6  ;;  %2285 = vadd.xlane.f32.xlu0 %v3526_v50  ;;  %v2134_v45 = vpop.xlane.xlu0 %2133 }
 0x382   : > { %v4740_v23 = vsub.f32 %v4612_v32, %v2134_v45 }
 0x383   : > { %v2231_v63 = vmul.f32 1.442695, %v4737_v57 }
 0x384   : > { %v2229_v17 = vmul.f32 1.442695, %v4740_v23 }
 0x385   : > { %3531 = vpow2.f32 %v2231_v63 }
 0x386   : > { %3533 = vpow2.f32 %v2229_v17 }
 0x387   : > { %v3528_v36 = vpop.eup %3527 }
 0x388   : > { %v3530_v42 = vpop.eup %3529  ;;  %2291 = vadd.xlane.f32.xlu1 %v3528_v36  ;;  %v2140_v41 = vpop.xlane.xlu1 %2139 }
 0x389   : > { %v4745_v11 = vsub.f32 %v4617_v55, %v2140_v41  ;;  %2289 = vadd.xlane.f32.xlu0 %v3530_v42  ;;  %v2138_v4 = vpop.xlane.xlu0 %2137 }
 0x38a   : > { %v4748_v10 = vsub.f32 %v4620_v20, %v2138_v4 }
 0x38b   : > { %v2235_v32 = vmul.f32 1.442695, %v4745_v11 }
 0x38c   : > { %v2233_v54 = vmul.f32 1.442695, %v4748_v10 }
 0x38d   : > { %3535 = vpow2.f32 %v2235_v32 }
 0x38e   : > { %3537 = vpow2.f32 %v2233_v54 }
 0x38f   : > { %v3532_v25 = vpop.eup %3531 }
 0x390   : > { %v3534_v47 = vpop.eup %3533  ;;  %2295 = vadd.xlane.f32.xlu1 %v3532_v25  ;;  %v2144_v0 = vpop.xlane.xlu1 %2143 }
 0x391   : > { %v4753_v30 = vsub.f32 %v4625_v31, %v2144_v0  ;;  %2293 = vadd.xlane.f32.xlu0 %v3534_v47  ;;  %v2142_v55 = vpop.xlane.xlu0 %2141 }
 0x392   : > { %v4756_v14 = vsub.f32 %v4628_v3, %v2142_v55 }
 0x393   : > { %v2239_v20 = vmul.f32 1.442695, %v4753_v30 }
 0x394   : > { %v2237_v19 = vmul.f32 1.442695, %v4756_v14 }
 0x395   : > { %3539 = vpow2.f32 %v2239_v20 }
 0x396   : > { %3541 = vpow2.f32 %v2237_v19 }
 0x397   : > { %v3536_v8 = vpop.eup %3535 }
 0x398   : > { %v3538_v48 = vpop.eup %3537  ;;  %2299 = vadd.xlane.f32.xlu1 %v3536_v8  ;;  %v2148_v39 = vpop.xlane.xlu1 %2147 }
 0x399   : > { %v4761_v24 = vsub.f32 %v4633_v12, %v2148_v39  ;;  %2297 = vadd.xlane.f32.xlu0 %v3538_v48  ;;  %v2146_v31 = vpop.xlane.xlu0 %2145 }
 0x39a   : > { %v4764_v61 = vsub.f32 %v4636_v28, %v2146_v31 }
 0x39b   : > { %v2243_v3 = vmul.f32 1.442695, %v4761_v24 }
 0x39c   : > { %v2241_v60 = vmul.f32 1.442695, %v4764_v61 }
 0x39d   : > { %3543 = vpow2.f32 %v2243_v3 }
 0x39e   : > { %3545 = vpow2.f32 %v2241_v60 }
 0x39f   : > { %v3540_v21 = vpop.eup %3539 }
 0x3a0   : > { %v3542_v53 = vpop.eup %3541  ;;  %2303 = vadd.xlane.f32.xlu1 %v3540_v21 }
 0x3a1   : > { %2301 = vadd.xlane.f32.xlu0 %v3542_v53 }
 0x3a7   : > { %v3544_v43 = vpop.eup %3543 }
 0x3a8   : > { %v3546_v18 = vpop.eup %3545  ;;  %2307 = vadd.xlane.f32.xlu1 %v3544_v43 }
 0x3a9   : > { %2305 = vadd.xlane.f32.xlu0 %v3546_v18 }
 0x3bd   : > { %v2248_v12 = vpop.xlane.xlu1 %2247 }
 0x3be   : > { %3547 = vlog2.f32 %v2248_v12 }
 0x3c1   : > { %v2246_v22 = vpop.xlane.xlu0 %2245 }
 0x3c2   : > { %3549 = vlog2.f32 %v2246_v22 }
 0x3c5   : > { %v2252_v28 = vpop.xlane.xlu1 %2251 }
 0x3c6   : > { %3551 = vlog2.f32 %v2252_v28 }
 0x3c8   : > { %v3548_v5 = vpop.eup %3547 }
 0x3c9   : > { %v2250_v46 = vpop.xlane.xlu0 %2249  ;;  %v2312_v50 = vmul.f32 0.6931472, %v3548_v5 }
 0x3ca   : > { %3553 = vlog2.f32 %v2250_v46 }
 0x3cb   : > { %v2374_v36 = vsub.f32 %v4641_v26, %v2312_v50 }
 0x3cc   : > { %v3550_v6 = vpop.eup %3549 }
 0x3cd   : > { %v2310_v45 = vmul.f32 0.6931472, %v3550_v6  ;;  %v2256_v63 = vpop.xlane.xlu1 %2255 }
 0x3ce   : > { %3555 = vlog2.f32 %v2256_v63  ;;  %v2254_v17 = vpop.xlane.xlu0 %2253 }
 0x3cf   : > { %v2373_v42 = vsub.f32 %v4645_v37, %v2310_v45  ;;  %3557 = vlog2.f32 %v2254_v17 }
 0x3d0   : > { %v3552_v41 = vpop.eup %3551 }
 0x3d1   : > { %v2798_v4 = vpack.c.bf16 %v2374_v36, %v2373_v42  ;;  %v2316_v32 = vmul.f32 0.6931472, %v3552_v41 }
 0x3d3   : > { %2799 = vst [vmem:[%s4774_s7] sm:$0xff] %v2798_v4   ;;  %v2376_v26 = vsub.f32 %v4649_v34, %v2316_v32 }
 0x3d4   : > { %v3554_v54 = vpop.eup %3553 }
 0x3d5   : > { %v2314_v25 = vmul.f32 0.6931472, %v3554_v54  ;;  %v2260_v47 = vpop.xlane.xlu1 %2259 }
 0x3d6   : > { %3559 = vlog2.f32 %v2260_v47  ;;  %v2258_v0 = vpop.xlane.xlu0 %2257 }
 0x3d7   : > { %v2375_v37 = vsub.f32 %v4653_v44, %v2314_v25  ;;  %3561 = vlog2.f32 %v2258_v0 }
 0x3d8   : > { %v3556_v55 = vpop.eup %3555 }
 0x3d9   : > { %v3558_v20 = vpop.eup %3557  ;;  %v2803_v19 = vpack.c.bf16 %v2376_v26, %v2375_v37  ;;  %v2320_v8 = vmul.f32 0.6931472, %v3556_v55 }
 0x3da   : > { %v2318_v48 = vmul.f32 0.6931472, %v3558_v20 }
 0x3db   : > { %2875 = vst [vmem:[%s4774_s7 + $0x8] sm:$0xff] %v2803_v19   ;;  %v2378_v39 = vsub.f32 %v4657_v49, %v2320_v8 }
 0x3dc   : > { %v2377_v31 = vsub.f32 %v4660_v27, %v2318_v48 }
 0x3dd   : > { %v2264_v3 = vpop.xlane.xlu1 %2263 }
 0x3de   : > { %v2808_v60 = vpack.c.bf16 %v2378_v39, %v2377_v31  ;;  %3563 = vlog2.f32 %v2264_v3  ;;  %v2262_v21 = vpop.xlane.xlu0 %2261 }
 0x3df   : > { %3565 = vlog2.f32 %v2262_v21 }
 0x3e0   : > { %v3560_v34 = vpop.eup %3559  ;;  %2876 = vst [vmem:[%s4774_s7 + $0x10] sm:$0xff] %v2808_v60  }
 0x3e1   : > { %v3562_v44 = vpop.eup %3561  ;;  %v2324_v53 = vmul.f32 0.6931472, %v3560_v34 }
 0x3e2   : > { %v2322_v43 = vmul.f32 0.6931472, %v3562_v44 }
 0x3e3   : > { %v2380_v18 = vsub.f32 %v4665_v13, %v2324_v53 }
 0x3e4   : > { %v2379_v12 = vsub.f32 %v4668_v51, %v2322_v43 }
 0x3e5   : > { %v2268_v22 = vpop.xlane.xlu1 %2267 }
 0x3e6   : > { %v2813_v28 = vpack.c.bf16 %v2380_v18, %v2379_v12  ;;  %3567 = vlog2.f32 %v2268_v22  ;;  %v2266_v49 = vpop.xlane.xlu0 %2265 }
 0x3e7   : > { %3569 = vlog2.f32 %v2266_v49 }
 0x3e8   : > { %v3564_v27 = vpop.eup %3563  ;;  %2877 = vst [vmem:[%s4774_s7 + $0x18] sm:$0xff] %v2813_v28  }
 0x3e9   : > { %v3566_v5 = vpop.eup %3565  ;;  %v2328_v46 = vmul.f32 0.6931472, %v3564_v27 }
 0x3ea   : > { %v2326_v50 = vmul.f32 0.6931472, %v3566_v5 }
 0x3eb   : > { %v2382_v6 = vsub.f32 %v4673_v35, %v2328_v46 }
 0x3ec   : > { %v2381_v45 = vsub.f32 %v4676_v15, %v2326_v50 }
 0x3ed   : > { %v2272_v63 = vpop.xlane.xlu1 %2271 }
 0x3ee   : > { %v2818_v17 = vpack.c.bf16 %v2382_v6, %v2381_v45  ;;  %3571 = vlog2.f32 %v2272_v63  ;;  %v2270_v13 = vpop.xlane.xlu0 %2269 }
 0x3ef   : > { %3573 = vlog2.f32 %v2270_v13 }
 0x3f0   : > { %v3568_v51 = vpop.eup %3567  ;;  %2878 = vst [vmem:[%s4774_s7 + $0x20] sm:$0xff] %v2818_v17  }
 0x3f1   : > { %v3570_v36 = vpop.eup %3569  ;;  %v2332_v42 = vmul.f32 0.6931472, %v3568_v51 }
 0x3f2   : > { %v2330_v41 = vmul.f32 0.6931472, %v3570_v36 }
 0x3f3   : > { %v2384_v4 = vsub.f32 %v4681_v9, %v2332_v42 }
 0x3f4   : > { %v2383_v32 = vsub.f32 %v4684_v59, %v2330_v41 }
 0x3f5   : > { %v2276_v54 = vpop.xlane.xlu1 %2275 }
 0x3f6   : > { %v2823_v25 = vpack.c.bf16 %v2384_v4, %v2383_v32  ;;  %3575 = vlog2.f32 %v2276_v54  ;;  %v2274_v35 = vpop.xlane.xlu0 %2273 }
 0x3f7   : > { %3577 = vlog2.f32 %v2274_v35 }
 0x3f8   : > { %v3572_v15 = vpop.eup %3571  ;;  %2879 = vst [vmem:[%s4774_s7 + $0x28] sm:$0xff] %v2823_v25  }
 0x3f9   : > { %v3574_v47 = vpop.eup %3573  ;;  %v2336_v0 = vmul.f32 0.6931472, %v3572_v15 }
 0x3fa   : > { %v2334_v26 = vmul.f32 0.6931472, %v3574_v47 }
 0x3fb   : > { %v2386_v37 = vsub.f32 %v4689_v7, %v2336_v0 }
 0x3fc   : > { %v2385_v55 = vsub.f32 %v4692_v29, %v2334_v26 }
 0x3fd   : > { %v2280_v20 = vpop.xlane.xlu1 %2279 }
 0x3fe   : > { %v2828_v19 = vpack.c.bf16 %v2386_v37, %v2385_v55  ;;  %3579 = vlog2.f32 %v2280_v20  ;;  %v2278_v9 = vpop.xlane.xlu0 %2277 }
 0x3ff   : > { %3581 = vlog2.f32 %v2278_v9 }
 0x400   : > { %v3576_v59 = vpop.eup %3575  ;;  %2880 = vst [vmem:[%s4774_s7 + $0x30] sm:$0xff] %v2828_v19  }
 0x401   : > { %v3578_v8 = vpop.eup %3577  ;;  %v2340_v48 = vmul.f32 0.6931472, %v3576_v59 }
 0x402   : > { %v2338_v39 = vmul.f32 0.6931472, %v3578_v8 }
 0x403   : > { %v2388_v31 = vsub.f32 %v4697_v38, %v2340_v48 }
 0x404   : > { %v2387_v3 = vsub.f32 %v4700_v58, %v2338_v39 }
 0x405   : > { %v2284_v60 = vpop.xlane.xlu1 %2283 }
 0x406   : > { %v2833_v21 = vpack.c.bf16 %v2388_v31, %v2387_v3  ;;  %3583 = vlog2.f32 %v2284_v60  ;;  %v2282_v7 = vpop.xlane.xlu0 %2281 }
 0x407   : > { %3585 = vlog2.f32 %v2282_v7 }
 0x408   : > { %v3580_v29 = vpop.eup %3579  ;;  %2881 = vst [vmem:[%s4774_s7 + $0x38] sm:$0xff] %v2833_v21  }
 0x409   : > { %v3582_v34 = vpop.eup %3581  ;;  %v2344_v44 = vmul.f32 0.6931472, %v3580_v29 }
 0x40a   : > { %v2342_v53 = vmul.f32 0.6931472, %v3582_v34 }
 0x40b   : > { %v2390_v43 = vsub.f32 %v4705_v62, %v2344_v44 }
 0x40c   : > { %v2389_v18 = vsub.f32 %v4708_v2, %v2342_v53 }
 0x40d   : > { %v2288_v12 = vpop.xlane.xlu1 %2287 }
 0x40e   : > { %v2838_v22 = vpack.c.bf16 %v2390_v43, %v2389_v18  ;;  %3587 = vlog2.f32 %v2288_v12  ;;  %v2286_v38 = vpop.xlane.xlu0 %2285 }
 0x40f   : > { %3589 = vlog2.f32 %v2286_v38 }
 0x410   : > { %v3584_v58 = vpop.eup %3583  ;;  %2882 = vst [vmem:[%s4774_s7 + $0x40] sm:$0xff] %v2838_v22  }
 0x411   : > { %v3586_v28 = vpop.eup %3585  ;;  %v2348_v49 = vmul.f32 0.6931472, %v3584_v58 }
 0x412   : > { %v2346_v27 = vmul.f32 0.6931472, %v3586_v28 }
 0x413   : > { %v2392_v5 = vsub.f32 %v4713_v52, %v2348_v49 }
 0x414   : > { %v2391_v46 = vsub.f32 %v4716_v33, %v2346_v27 }
 0x415   : > { %v2292_v50 = vpop.xlane.xlu1 %2291 }
 0x416   : > { %v2843_v6 = vpack.c.bf16 %v2392_v5, %v2391_v46  ;;  %3591 = vlog2.f32 %v2292_v50  ;;  %v2290_v62 = vpop.xlane.xlu0 %2289 }
 0x417   : > { %3593 = vlog2.f32 %v2290_v62 }
 0x418   : > { %v3588_v2 = vpop.eup %3587  ;;  %2883 = vst [vmem:[%s4774_s7 + $0x48] sm:$0xff] %v2843_v6  }
 0x419   : > { %v3590_v45 = vpop.eup %3589  ;;  %v2352_v63 = vmul.f32 0.6931472, %v3588_v2 }
 0x41a   : > { %v2350_v17 = vmul.f32 0.6931472, %v3590_v45 }
 0x41b   : > { %v2394_v13 = vsub.f32 %v4721_v1, %v2352_v63 }
 0x41c   : > { %v2393_v51 = vsub.f32 %v4724_v16, %v2350_v17 }
 0x41d   : > { %v2296_v36 = vpop.xlane.xlu1 %2295 }
 0x41e   : > { %v2848_v42 = vpack.c.bf16 %v2394_v13, %v2393_v51  ;;  %3595 = vlog2.f32 %v2296_v36  ;;  %v2294_v52 = vpop.xlane.xlu0 %2293 }
 0x41f   : > { %3597 = vlog2.f32 %v2294_v52 }
 0x420   : > { %v3592_v33 = vpop.eup %3591  ;;  %2884 = vst [vmem:[%s4774_s7 + $0x50] sm:$0xff] %v2848_v42  }
 0x421   : > { %v3594_v41 = vpop.eup %3593  ;;  %v2356_v4 = vmul.f32 0.6931472, %v3592_v33 }
 0x422   : > { %v2354_v32 = vmul.f32 0.6931472, %v3594_v41 }
 0x423   : > { %v2396_v54 = vsub.f32 %v4729_v56, %v2356_v4 }
 0x424   : > { %v2395_v25 = vsub.f32 %v4732_v40, %v2354_v32 }
 0x425   : > { %v2300_v35 = vpop.xlane.xlu1 %2299 }
 0x426   : > { %v2853_v15 = vpack.c.bf16 %v2396_v54, %v2395_v25  ;;  %3599 = vlog2.f32 %v2300_v35  ;;  %v2298_v1 = vpop.xlane.xlu0 %2297 }
 0x427   : > { %3601 = vlog2.f32 %v2298_v1 }
 0x428   : > { %v3596_v16 = vpop.eup %3595  ;;  %2885 = vst [vmem:[%s4774_s7 + $0x58] sm:$0xff] %v2853_v15  }
 0x429   : > { %v3598_v47 = vpop.eup %3597  ;;  %v2360_v0 = vmul.f32 0.6931472, %v3596_v16 }
 0x42a   : > { %v2358_v26 = vmul.f32 0.6931472, %v3598_v47 }
 0x42b   : > { %v2398_v37 = vsub.f32 %v4737_v57, %v2360_v0 }
 0x42c   : > { %v2397_v55 = vsub.f32 %v4740_v23, %v2358_v26 }
 0x42d   : > { %v2304_v20 = vpop.xlane.xlu1 %2303 }
 0x42e   : > { %v2858_v19 = vpack.c.bf16 %v2398_v37, %v2397_v55  ;;  %3603 = vlog2.f32 %v2304_v20  ;;  %v2302_v56 = vpop.xlane.xlu0 %2301 }
 0x42f   : > { %3605 = vlog2.f32 %v2302_v56 }
 0x430   : > { %v3600_v40 = vpop.eup %3599  ;;  %2886 = vst [vmem:[%s4774_s7 + $0x60] sm:$0xff] %v2858_v19  }
 0x431   : > { %v3602_v9 = vpop.eup %3601  ;;  %v2364_v59 = vmul.f32 0.6931472, %v3600_v40 }
 0x432   : > { %v2362_v8 = vmul.f32 0.6931472, %v3602_v9 }
 0x433   : > { %v2400_v48 = vsub.f32 %v4745_v11, %v2364_v59 }
 0x434   : > { %v2399_v39 = vsub.f32 %v4748_v10, %v2362_v8 }
 0x435   : > { %v2308_v31 = vpop.xlane.xlu1 %2307 }
 0x436   : > { %v2863_v57 = vpack.c.bf16 %v2400_v48, %v2399_v39  ;;  %3607 = vlog2.f32 %v2308_v31  ;;  %v2306_v23 = vpop.xlane.xlu0 %2305 }
 0x437   : > { %3609 = vlog2.f32 %v2306_v23 }
 0x438   : > { %v3604_v3 = vpop.eup %3603  ;;  %2887 = vst [vmem:[%s4774_s7 + $0x68] sm:$0xff] %v2863_v57  }
 0x439   : > { %v3606_v60 = vpop.eup %3605  ;;  %v2368_v21 = vmul.f32 0.6931472, %v3604_v3 }
 0x43a   : > { %v2366_v7 = vmul.f32 0.6931472, %v3606_v60 }
 0x43b   : > { %v2402_v29 = vsub.f32 %v4753_v30, %v2368_v21 }
 0x43c   : > { %v2401_v34 = vsub.f32 %v4756_v14, %v2366_v7 }
 0x43e   : > { %v2868_v44 = vpack.c.bf16 %v2402_v29, %v2401_v34 }
 0x440   : > { %v3608_v11 = vpop.eup %3607  ;;  %2888 = vst [vmem:[%s4774_s7 + $0x70] sm:$0xff] %v2868_v44  }
 0x441   : > { %v3610_v53 = vpop.eup %3609  ;;  %v2372_v10 = vmul.f32 0.6931472, %v3608_v11 }
 0x442   : > { %v2370_v43 = vmul.f32 0.6931472, %v3610_v53 }
 0x443   : > { %v2404_v18 = vsub.f32 %v4761_v24, %v2372_v10 }
 0x444   : > { %v2403_v12 = vsub.f32 %v4764_v61, %v2370_v43 }
 0x446   : > { %v2873_v22 = vpack.c.bf16 %v2404_v18, %v2403_v12 }
 0x448   : > { %2889 = vst [vmem:[%s4774_s7 + $0x78] sm:$0xff] %v2873_v22  }
 0x449 PF: > { %s15_s18 = sadd.s32 1, %s3617_s18  }
 0x44a   : > { %p12_p4 = scmp.ge.s32.totalorder %s15_s18, 4  }
 0x44c   :  { %14 = sbr.rel (!%p12_p4) target bundleno = 1 (0x1), region = 70 }

</bundles_post_ra>
